<compile_context>
chip_gen: v7x
topology: tpu7x:2x2x1
jax: 0.10.0
libtpu: 0.0.40
codegen_flags: <defaults>
</compile_context>

<pallas_src>
import random

import jax
import jax.numpy as jnp
from jax.experimental import pallas as pl
from jax.experimental.pallas import tpu as pltpu

# torchvision rgb_to_grayscale weights
_RW, _GW, _BW = 0.2989, 0.587, 0.114

# Flattened-spatial tiling: each grid step processes a (3, _ROWS, _LANE) slab.
# 3 * 8 * 512 * 4 B = 48 KiB per block (double-buffered in+out ~192 KiB), far
# below every generation's VMEM. Sweep _LANE in {256..2048} per chip if needed
# (bigger amortizes the ~0.35us/step overhead, smaller reduces vreg pressure
# in the hue path).
_LANE = 512
_ROWS = 8


# ---------------------------------------------------------------------------
# Shared hue math (used by the kernel with an EUP reciprocal and by the pure
# JAX reference with an exact divide). Operates on per-channel planes.
# ---------------------------------------------------------------------------
def _hue_rgb(r, g, b, delta, recip):
    """torchvision adjust_hue (rgb->hsv, shift, hsv->rgb). recip(x) ~= 1/x."""
    maxc = jnp.maximum(jnp.maximum(r, g), b)
    minc = jnp.minimum(jnp.minimum(r, g), b)
    eqc = maxc == minc
    cr = maxc - minc
    ones = jnp.ones_like(maxc)
    s = cr * recip(jnp.where(eqc, ones, maxc))
    inv_cr = recip(jnp.where(eqc, ones, cr))
    rc = (maxc - r) * inv_cr
    gc = (maxc - g) * inv_cr
    bc = (maxc - b) * inv_cr
    hr = jnp.where(maxc == r, bc - gc, 0.0)
    hg = jnp.where((maxc == g) & (maxc != r), 2.0 + rc - bc, 0.0)
    hb = jnp.where((maxc != g) & (maxc != r), 4.0 + gc - rc, 0.0)
    # mod(mod(x/6 + 1, 1) + delta, 1) == frac(x/6 + 1 + delta); argument > 0
    # for |delta| <= 0.5, so a single x - floor(x) suffices.
    h_shift = (hr + hg + hb) * (1.0 / 6.0) + (1.0 + delta)
    h = h_shift - jnp.floor(h_shift)
    h6 = h * 6.0
    fl = jnp.floor(h6)
    f = h6 - fl
    i_f = jnp.where(fl >= 6.0, fl - 6.0, fl)  # stay in float; no int32 cast
    v = maxc
    p = jnp.clip(v * (1.0 - s), 0.0, 1.0)
    q = jnp.clip(v * (1.0 - s * f), 0.0, 1.0)
    t = jnp.clip(v * (1.0 - s * (1.0 - f)), 0.0, 1.0)

    def sel(tbl):
        out = tbl[5]
        for k in range(5):
            out = jnp.where(i_f == float(k), tbl[k], out)
        return out

    return (sel((v, q, p, p, t, v)),
            sel((t, v, v, q, p, p)),
            sel((p, p, t, v, v, q)))


def _fast_recip(x):
    # EUP approximate reciprocal seed (free slot) + one Newton-Raphson step on
    # the VPU; avoids the multi-op f32 divide sequence while staying ~f32-accurate.
    inv = pl.reciprocal(x, approx=True)
    return inv * (2.0 - x * inv)


# ---------------------------------------------------------------------------
# Pallas kernel
# ---------------------------------------------------------------------------
def color_aug_kernel(fac_ref, mean_ref, img_ref, out_ref):
    # fac_ref : SMEM (9,) f32 = [bf, cf, sf, hd, apply_b, apply_c, apply_s, apply_h, order]
    # mean_ref: SMEM (N,) f32 = per-image grayscale mean (adjust_contrast)
    # img_ref / out_ref: VMEM (1, 3, _ROWS, _LANE)
    n = pl.program_id(0)
    bf, cf, sf, hd = fac_ref[0], fac_ref[1], fac_ref[2], fac_ref[3]
    ab, ac, asat, ah = fac_ref[4], fac_ref[5], fac_ref[6], fac_ref[7]
    order = fac_ref[8]
    gmean = mean_ref[n]

    # Brightness fused into the input->output copy (scalar-gated).
    @pl.when(ab > 0.5)
    def _():
        out_ref[0] = jnp.clip(bf * img_ref[0], 0.0, 1.0)

    @pl.when(ab <= 0.5)
    def _():
        out_ref[0] = img_ref[0]

    def _contrast():
        out_ref[0] = jnp.clip(cf * out_ref[0] + (1.0 - cf) * gmean, 0.0, 1.0)

    # order > 0.5 : contrast -> saturation -> hue
    # else        : saturation -> hue -> contrast
    # saturation/hue keep their relative order in both branches, so only the
    # cheap contrast step is branch-duplicated; the heavy hue path exists once.
    @pl.when((order > 0.5) & (ac > 0.5))
    def _():
        _contrast()

    @pl.when(asat > 0.5)
    def _():
        x = out_ref[0]
        gray = _RW * x[0] + _GW * x[1] + _BW * x[2]
        out_ref[0] = jnp.clip(sf * x + (1.0 - sf) * gray[None], 0.0, 1.0)

    @pl.when(ah > 0.5)
    def _():
        x = out_ref[0]
        r2, g2, b2 = _hue_rgb(x[0], x[1], x[2], hd, _fast_recip)
        out_ref[0, 0] = r2
        out_ref[0, 1] = g2
        out_ref[0, 2] = b2

    @pl.when((order <= 0.5) & (ac > 0.5))
    def _():
        _contrast()


def color_aug_ssd(img, factors, *, lane=_LANE, rows_per_block=_ROWS):
    """img: (N, 3, H, W) float32 in [0, 1]; factors: (9,) float32."""
    N, C, H, W = img.shape
    assert C == 3, "ColorAugSSD expects RGB images"
    assert img.dtype == jnp.float32
    S = H * W
    flat = img.reshape(N, C, S)

    # Full-image grayscale mean (torchvision adjust_contrast semantics),
    # precomputed so the kernel can tile the spatial axis freely.
    gray_mean = jnp.mean(
        _RW * flat[:, 0] + _GW * flat[:, 1] + _BW * flat[:, 2], axis=-1
    ).astype(jnp.float32)

    blk = lane * rows_per_block
    s_pad = ((S + blk - 1) // blk) * blk
    if s_pad != S:
        flat = jnp.pad(flat, ((0, 0), (0, 0), (0, s_pad - S)))
    rows = s_pad // lane
    x = flat.reshape(N, C, rows, lane)

    grid = (N, rows // rows_per_block)
    spec = pl.BlockSpec((1, C, rows_per_block, lane),
                        lambda n, t, fac, mean: (n, 0, t, 0))
    out = pl.pallas_call(
        color_aug_kernel,
        out_shape=jax.ShapeDtypeStruct(x.shape, img.dtype),
        grid_spec=pltpu.PrefetchScalarGridSpec(
            num_scalar_prefetch=2,
            grid=grid,
            in_specs=[spec],
            out_specs=spec,
        ),
        compiler_params=pltpu.CompilerParams(
            # Both axes are independent (contrast mean precomputed) -> both
            # parallel; feeds v7x's 2 TensorCores. Explicit, modest VMEM limit.
            dimension_semantics=("parallel", "parallel"),
            vmem_limit_bytes=32 * 1024 * 1024,
        ),
    )(factors, gray_mean, x)
    return out.reshape(N, C, s_pad)[:, :, :S].reshape(N, C, H, W)


# ---------------------------------------------------------------------------
# Host-side parameter sampling (mirrors the Python `random` control flow of
# the PyTorch module, deterministic via an explicit seed).
# ---------------------------------------------------------------------------
def sample_params(seed=0, brightness_delta=32, contrast_low=0.5, contrast_high=1.5,
                  saturation_low=0.5, saturation_high=1.5, hue_delta=0.1):
    rng = random.Random(seed)

    apply_b = rng.random() > 0.5
    bf = 1.0 + rng.uniform(-brightness_delta, brightness_delta) / 255.0 if apply_b else 1.0

    order_csh = rng.random() > 0.5  # True: contrast->saturation->hue

    def _draw(lo, hi, default):
        a = rng.random() > 0.5
        return a, (rng.uniform(lo, hi) if a else default)

    if order_csh:
        apply_c, cf = _draw(contrast_low, contrast_high, 1.0)
        apply_s, sf = _draw(saturation_low, saturation_high, 1.0)
        apply_h, hd = _draw(-hue_delta, hue_delta, 0.0)
    else:
        apply_s, sf = _draw(saturation_low, saturation_high, 1.0)
        apply_h, hd = _draw(-hue_delta, hue_delta, 0.0)
        apply_c, cf = _draw(contrast_low, contrast_high, 1.0)

    return jnp.array(
        [bf, cf, sf, hd,
         float(apply_b), float(apply_c), float(apply_s), float(apply_h),
         float(order_csh)],
        dtype=jnp.float32,
    )


# ---------------------------------------------------------------------------
# Pure-JAX reference (exact divides) for correctness checking.
# ---------------------------------------------------------------------------
def _reference_single(x, p, gmean):
    bf, cf, sf, hd, ab, ac, asat, ah, order = p

    def contrast(y):
        return jnp.clip(cf * y + (1.0 - cf) * gmean, 0.0, 1.0)

    def saturation(y):
        gray = _RW * y[0] + _GW * y[1] + _BW * y[2]
        return jnp.clip(sf * y + (1.0 - sf) * gray[None], 0.0, 1.0)

    def hue(y):
        r2, g2, b2 = _hue_rgb(y[0], y[1], y[2], hd, lambda z: 1.0 / z)
        return jnp.stack((r2, g2, b2), axis=0)

    if ab > 0.5:
        x = jnp.clip(bf * x, 0.0, 1.0)
    if order > 0.5:
        if ac > 0.5:
            x = contrast(x)
        if asat > 0.5:
            x = saturation(x)
        if ah > 0.5:
            x = hue(x)
    else:
        if asat > 0.5:
            x = saturation(x)
        if ah > 0.5:
            x = hue(x)
        if ac > 0.5:
            x = contrast(x)
    return x


def reference(img, factors):
    p = [float(v) for v in factors]
    N = img.shape[0]
    flat = img.reshape(N, 3, -1)
    gmeans = jnp.mean(_RW * flat[:, 0] + _GW * flat[:, 1] + _BW * flat[:, 2], axis=-1)
    return jnp.stack([_reference_single(img[i], p, gmeans[i]) for i in range(N)], axis=0)


if __name__ == "__main__":
    key = jax.random.PRNGKey(0)
    # The hue path uses an EUP approximate reciprocal (+ one Newton step);
    # observed error vs the exact-divide reference is well below this bound,
    # which is kept loose to cover any generation's reciprocal seed precision.
    TOL = 1e-3

    def check(idx, shape, factors, name):
        img = jax.random.uniform(jax.random.fold_in(key, idx), shape, dtype=jnp.float32)
        out = jax.block_until_ready(color_aug_ssd(img, factors))
        ref = reference(img, factors)
        assert out.shape == img.shape and out.dtype == img.dtype
        assert jnp.allclose(out, ref, atol=TOL, rtol=TOL), f"mismatch ({name})"

    # Case 1: faithfully-sampled random params (deterministic seed).
    check(0, (2, 3, 16, 16), sample_params(seed=0), "sampled")

    # Case 2: every augmentation forced on, contrast->saturation->hue ordering.
    factors_csh = jnp.array(
        [1.0 + 20.0 / 255.0, 1.2, 0.8, 0.05, 1.0, 1.0, 1.0, 1.0, 1.0],
        dtype=jnp.float32)
    check(1, (2, 3, 16, 16), factors_csh, "all_on_csh")

    # Case 3: every augmentation on, other ordering, larger non-square image ->
    # exercises the multi-tile spatial grid and the pad/unpad path.
    factors_shc = jnp.array(
        [1.0 - 12.0 / 255.0, 0.7, 1.4, -0.08, 1.0, 1.0, 1.0, 1.0, 0.0],
        dtype=jnp.float32)
    check(2, (2, 3, 96, 80), factors_shc, "all_on_shc_tiled")

    print("KERNEL_OK")
</pallas_src>

<mosaic_0001>
module attributes {stable_mosaic.version = 11 : i64} {
  func.func @color_aug_kernel(%arg0: i32, %arg1: i32, %arg2: memref<9xf32, #tpu.memory_space<smem>>, %arg3: memref<2xf32, #tpu.memory_space<smem>>, %arg4: memref<1x3x8x512xf32, #tpu.memory_space<vmem>>, %arg5: memref<1x3x8x512xf32, #tpu.memory_space<vmem>>) attributes {dimension_semantics = [#tpu.dimension_semantics<parallel>, #tpu.dimension_semantics<parallel>], iteration_bounds = array<i64: 2, 1>, scalar_prefetch = 2 : i64, scratch_operands = 0 : i64, tpu.core_type = #tpu.core_type<tc>, window_params = [{transform_indices = @transform_0, window_bounds = array<i64: 1, 3, 8, 512>}, {transform_indices = @transform_1, window_bounds = array<i64: 1, 3, 8, 512>}]} {
    %c0 = arith.constant 0 : index
    %0 = memref.load %arg2[%c0] : memref<9xf32, #tpu.memory_space<smem>>
    %c1 = arith.constant 1 : index
    %1 = memref.load %arg2[%c1] : memref<9xf32, #tpu.memory_space<smem>>
    %c2 = arith.constant 2 : index
    %2 = memref.load %arg2[%c2] : memref<9xf32, #tpu.memory_space<smem>>
    %c3 = arith.constant 3 : index
    %3 = memref.load %arg2[%c3] : memref<9xf32, #tpu.memory_space<smem>>
    %c4 = arith.constant 4 : index
    %4 = memref.load %arg2[%c4] : memref<9xf32, #tpu.memory_space<smem>>
    %c5 = arith.constant 5 : index
    %5 = memref.load %arg2[%c5] : memref<9xf32, #tpu.memory_space<smem>>
    %c6 = arith.constant 6 : index
    %6 = memref.load %arg2[%c6] : memref<9xf32, #tpu.memory_space<smem>>
    %c7 = arith.constant 7 : index
    %7 = memref.load %arg2[%c7] : memref<9xf32, #tpu.memory_space<smem>>
    %c8 = arith.constant 8 : index
    %8 = memref.load %arg2[%c8] : memref<9xf32, #tpu.memory_space<smem>>
    %9 = arith.index_cast %arg0 : i32 to index
    %10 = memref.load %arg3[%9] : memref<2xf32, #tpu.memory_space<smem>>
    %cst = arith.constant 5.000000e-01 : f32
    %11 = arith.cmpf ogt, %4, %cst : f32
    %12 = arith.extui %11 : i1 to i32
    %c0_i32 = arith.constant 0 : i32
    %13 = arith.cmpi ne, %12, %c0_i32 : i32
    scf.if %13 {
      %c0_12 = arith.constant 0 : index
      %c0_13 = arith.constant 0 : index
      %c0_14 = arith.constant 0 : index
      %c0_15 = arith.constant 0 : index
      %33 = vector.load %arg4[%c0_12, %c0_13, %c0_14, %c0_15] : memref<1x3x8x512xf32, #tpu.memory_space<vmem>>, vector<1x3x8x512xf32>
      %34 = vector.shape_cast %33 : vector<1x3x8x512xf32> to vector<3x8x512xf32>
      %35 = vector.broadcast %0 : f32 to vector<3x8x512xf32>
      %36 = arith.mulf %35, %34 : vector<3x8x512xf32>
      %cst_16 = arith.constant 0.000000e+00 : f32
      %cst_17 = arith.constant 1.000000e+00 : f32
      %37 = vector.broadcast %cst_16 : f32 to vector<3x8x512xf32>
      %38 = arith.maximumf %37, %36 : vector<3x8x512xf32>
      %39 = vector.broadcast %cst_17 : f32 to vector<3x8x512xf32>
      %40 = arith.minimumf %39, %38 : vector<3x8x512xf32>
      %c0_18 = arith.constant 0 : index
      %c0_19 = arith.constant 0 : index
      %c0_20 = arith.constant 0 : index
      %c0_21 = arith.constant 0 : index
      %41 = vector.load %arg5[%c0_18, %c0_19, %c0_20, %c0_21] : memref<1x3x8x512xf32, #tpu.memory_space<vmem>>, vector<1x3x8x512xf32>
      %42 = vector.shape_cast %41 : vector<1x3x8x512xf32> to vector<3x8x512xf32>
      %43 = vector.shape_cast %40 : vector<3x8x512xf32> to vector<1x3x8x512xf32>
      tpu.vector_store %arg5[%c0_18, %c0_19, %c0_20, %c0_21], %43 {strides = array<i32>} : memref<1x3x8x512xf32, #tpu.memory_space<vmem>>, vector<1x3x8x512xf32>,
    } else {
    }
    %cst_0 = arith.constant 5.000000e-01 : f32
    %14 = arith.cmpf ole, %4, %cst_0 : f32
    %15 = arith.extui %14 : i1 to i32
    %c0_i32_1 = arith.constant 0 : i32
    %16 = arith.cmpi ne, %15, %c0_i32_1 : i32
    scf.if %16 {
      %c0_12 = arith.constant 0 : index
      %c0_13 = arith.constant 0 : index
      %c0_14 = arith.constant 0 : index
      %c0_15 = arith.constant 0 : index
      %33 = vector.load %arg4[%c0_12, %c0_13, %c0_14, %c0_15] : memref<1x3x8x512xf32, #tpu.memory_space<vmem>>, vector<1x3x8x512xf32>
      %34 = vector.shape_cast %33 : vector<1x3x8x512xf32> to vector<3x8x512xf32>
      %c0_16 = arith.constant 0 : index
      %c0_17 = arith.constant 0 : index
      %c0_18 = arith.constant 0 : index
      %c0_19 = arith.constant 0 : index
      %35 = vector.load %arg5[%c0_16, %c0_17, %c0_18, %c0_19] : memref<1x3x8x512xf32, #tpu.memory_space<vmem>>, vector<1x3x8x512xf32>
      %36 = vector.shape_cast %35 : vector<1x3x8x512xf32> to vector<3x8x512xf32>
      %37 = vector.shape_cast %34 : vector<3x8x512xf32> to vector<1x3x8x512xf32>
      tpu.vector_store %arg5[%c0_16, %c0_17, %c0_18, %c0_19], %37 {strides = array<i32>} : memref<1x3x8x512xf32, #tpu.memory_space<vmem>>, vector<1x3x8x512xf32>,
    } else {
    }
    %cst_2 = arith.constant 5.000000e-01 : f32
    %17 = arith.cmpf ogt, %8, %cst_2 : f32
    %cst_3 = arith.constant 5.000000e-01 : f32
    %18 = arith.cmpf ogt, %5, %cst_3 : f32
    %19 = arith.andi %17, %18 : i1
    %20 = arith.extui %19 : i1 to i32
    %c0_i32_4 = arith.constant 0 : i32
    %21 = arith.cmpi ne, %20, %c0_i32_4 : i32
    scf.if %21 {
      %c0_12 = arith.constant 0 : index
      %c0_13 = arith.constant 0 : index
      %c0_14 = arith.constant 0 : index
      %c0_15 = arith.constant 0 : index
      %33 = vector.load %arg5[%c0_12, %c0_13, %c0_14, %c0_15] : memref<1x3x8x512xf32, #tpu.memory_space<vmem>>, vector<1x3x8x512xf32>
      %34 = vector.shape_cast %33 : vector<1x3x8x512xf32> to vector<3x8x512xf32>
      %35 = vector.broadcast %1 : f32 to vector<3x8x512xf32>
      %36 = arith.mulf %35, %34 : vector<3x8x512xf32>
      %cst_16 = arith.constant 1.000000e+00 : f32
      %37 = arith.subf %cst_16, %1 : f32
      %38 = arith.mulf %37, %10 : f32
      %39 = vector.broadcast %38 : f32 to vector<3x8x512xf32>
      %40 = arith.addf %36, %39 : vector<3x8x512xf32>
      %cst_17 = arith.constant 0.000000e+00 : f32
      %cst_18 = arith.constant 1.000000e+00 : f32
      %41 = vector.broadcast %cst_17 : f32 to vector<3x8x512xf32>
      %42 = arith.maximumf %41, %40 : vector<3x8x512xf32>
      %43 = vector.broadcast %cst_18 : f32 to vector<3x8x512xf32>
      %44 = arith.minimumf %43, %42 : vector<3x8x512xf32>
      %c0_19 = arith.constant 0 : index
      %c0_20 = arith.constant 0 : index
      %c0_21 = arith.constant 0 : index
      %c0_22 = arith.constant 0 : index
      %45 = vector.load %arg5[%c0_19, %c0_20, %c0_21, %c0_22] : memref<1x3x8x512xf32, #tpu.memory_space<vmem>>, vector<1x3x8x512xf32>
      %46 = vector.shape_cast %45 : vector<1x3x8x512xf32> to vector<3x8x512xf32>
      %47 = vector.shape_cast %44 : vector<3x8x512xf32> to vector<1x3x8x512xf32>
      tpu.vector_store %arg5[%c0_19, %c0_20, %c0_21, %c0_22], %47 {strides = array<i32>} : memref<1x3x8x512xf32, #tpu.memory_space<vmem>>, vector<1x3x8x512xf32>,
    } else {
    }
    %cst_5 = arith.constant 5.000000e-01 : f32
    %22 = arith.cmpf ogt, %6, %cst_5 : f32
    %23 = arith.extui %22 : i1 to i32
    %c0_i32_6 = arith.constant 0 : i32
    %24 = arith.cmpi ne, %23, %c0_i32_6 : i32
    scf.if %24 {
      %c0_12 = arith.constant 0 : index
      %c0_13 = arith.constant 0 : index
      %c0_14 = arith.constant 0 : index
      %c0_15 = arith.constant 0 : index
      %33 = vector.load %arg5[%c0_12, %c0_13, %c0_14, %c0_15] : memref<1x3x8x512xf32, #tpu.memory_space<vmem>>, vector<1x3x8x512xf32>
      %34 = vector.shape_cast %33 : vector<1x3x8x512xf32> to vector<3x8x512xf32>
      %35 = vector.extract_strided_slice %34 {offsets = [0, 0, 0], sizes = [1, 8, 512], strides = [1, 1, 1]} : vector<3x8x512xf32> to vector<1x8x512xf32>
      %36 = vector.shape_cast %35 : vector<1x8x512xf32> to vector<8x512xf32>
      %cst_16 = arith.constant 2.989000e-01 : f32
      %37 = vector.broadcast %cst_16 : f32 to vector<8x512xf32>
      %38 = arith.mulf %37, %36 : vector<8x512xf32>
      %39 = vector.extract_strided_slice %34 {offsets = [1, 0, 0], sizes = [1, 8, 512], strides = [1, 1, 1]} : vector<3x8x512xf32> to vector<1x8x512xf32>
      %40 = vector.shape_cast %39 : vector<1x8x512xf32> to vector<8x512xf32>
      %cst_17 = arith.constant 5.870000e-01 : f32
      %41 = vector.broadcast %cst_17 : f32 to vector<8x512xf32>
      %42 = arith.mulf %41, %40 : vector<8x512xf32>
      %43 = arith.addf %38, %42 : vector<8x512xf32>
      %44 = vector.extract_strided_slice %34 {offsets = [2, 0, 0], sizes = [1, 8, 512], strides = [1, 1, 1]} : vector<3x8x512xf32> to vector<1x8x512xf32>
      %45 = vector.shape_cast %44 : vector<1x8x512xf32> to vector<8x512xf32>
      %cst_18 = arith.constant 1.140000e-01 : f32
      %46 = vector.broadcast %cst_18 : f32 to vector<8x512xf32>
      %47 = arith.mulf %46, %45 : vector<8x512xf32>
      %48 = arith.addf %43, %47 : vector<8x512xf32>
      %49 = vector.broadcast %2 : f32 to vector<3x8x512xf32>
      %50 = arith.mulf %49, %34 : vector<3x8x512xf32>
      %cst_19 = arith.constant 1.000000e+00 : f32
      %51 = arith.subf %cst_19, %2 : f32
      %52 = vector.shape_cast %48 : vector<8x512xf32> to vector<1x8x512xf32>
      %53 = vector.broadcast %51 : f32 to vector<1x8x512xf32>
      %54 = arith.mulf %53, %52 : vector<1x8x512xf32>
      %55 = vector.broadcast %54 : vector<1x8x512xf32> to vector<3x8x512xf32>
      %56 = arith.addf %50, %55 : vector<3x8x512xf32>
      %cst_20 = arith.constant 0.000000e+00 : f32
      %cst_21 = arith.constant 1.000000e+00 : f32
      %57 = vector.broadcast %cst_20 : f32 to vector<3x8x512xf32>
      %58 = arith.maximumf %57, %56 : vector<3x8x512xf32>
      %59 = vector.broadcast %cst_21 : f32 to vector<3x8x512xf32>
      %60 = arith.minimumf %59, %58 : vector<3x8x512xf32>
      %c0_22 = arith.constant 0 : index
      %c0_23 = arith.constant 0 : index
      %c0_24 = arith.constant 0 : index
      %c0_25 = arith.constant 0 : index
      %61 = vector.load %arg5[%c0_22, %c0_23, %c0_24, %c0_25] : memref<1x3x8x512xf32, #tpu.memory_space<vmem>>, vector<1x3x8x512xf32>
      %62 = vector.shape_cast %61 : vector<1x3x8x512xf32> to vector<3x8x512xf32>
      %63 = vector.shape_cast %60 : vector<3x8x512xf32> to vector<1x3x8x512xf32>
      tpu.vector_store %arg5[%c0_22, %c0_23, %c0_24, %c0_25], %63 {strides = array<i32>} : memref<1x3x8x512xf32, #tpu.memory_space<vmem>>, vector<1x3x8x512xf32>,
    } else {
    }
    %cst_7 = arith.constant 5.000000e-01 : f32
    %25 = arith.cmpf ogt, %7, %cst_7 : f32
    %26 = arith.extui %25 : i1 to i32
    %c0_i32_8 = arith.constant 0 : i32
    %27 = arith.cmpi ne, %26, %c0_i32_8 : i32
    scf.if %27 {
      %c0_12 = arith.constant 0 : index
      %c0_13 = arith.constant 0 : index
      %c0_14 = arith.constant 0 : index
      %c0_15 = arith.constant 0 : index
      %33 = vector.load %arg5[%c0_12, %c0_13, %c0_14, %c0_15] : memref<1x3x8x512xf32, #tpu.memory_space<vmem>>, vector<1x3x8x512xf32>
      %34 = vector.shape_cast %33 : vector<1x3x8x512xf32> to vector<3x8x512xf32>
      %35 = vector.extract_strided_slice %34 {offsets = [0, 0, 0], sizes = [1, 8, 512], strides = [1, 1, 1]} : vector<3x8x512xf32> to vector<1x8x512xf32>
      %36 = vector.shape_cast %35 : vector<1x8x512xf32> to vector<8x512xf32>
      %37 = vector.extract_strided_slice %34 {offsets = [1, 0, 0], sizes = [1, 8, 512], strides = [1, 1, 1]} : vector<3x8x512xf32> to vector<1x8x512xf32>
      %38 = vector.shape_cast %37 : vector<1x8x512xf32> to vector<8x512xf32>
      %39 = vector.extract_strided_slice %34 {offsets = [2, 0, 0], sizes = [1, 8, 512], strides = [1, 1, 1]} : vector<3x8x512xf32> to vector<1x8x512xf32>
      %40 = vector.shape_cast %39 : vector<1x8x512xf32> to vector<8x512xf32>
      %41 = arith.maximumf %36, %38 : vector<8x512xf32>
      %42 = arith.maximumf %41, %40 : vector<8x512xf32>
      %43 = arith.minimumf %36, %38 : vector<8x512xf32>
      %44 = arith.minimumf %43, %40 : vector<8x512xf32>
      %45 = arith.cmpf oeq, %42, %44 : vector<8x512xf32>
      %46 = arith.subf %42, %44 : vector<8x512xf32>
      %cst_16 = arith.constant 1.000000e+00 : f32
      %47 = vector.broadcast %cst_16 : f32 to vector<8x512xf32>
      %48 = arith.select %45, %47, %42 : vector<8x512xi1>, vector<8x512xf32>
      %49 = tpu.reciprocal %48 {approx = true} : vector<8x512xf32> -> vector<8x512xf32>
      %50 = arith.mulf %48, %49 : vector<8x512xf32>
      %cst_17 = arith.constant 2.000000e+00 : f32
      %51 = vector.broadcast %cst_17 : f32 to vector<8x512xf32>
      %52 = arith.subf %51, %50 : vector<8x512xf32>
      %53 = arith.mulf %49, %52 : vector<8x512xf32>
      %54 = arith.mulf %46, %53 : vector<8x512xf32>
      %55 = arith.select %45, %47, %46 : vector<8x512xi1>, vector<8x512xf32>
      %56 = tpu.reciprocal %55 {approx = true} : vector<8x512xf32> -> vector<8x512xf32>
      %57 = arith.mulf %55, %56 : vector<8x512xf32>
      %cst_18 = arith.constant 2.000000e+00 : f32
      %58 = vector.broadcast %cst_18 : f32 to vector<8x512xf32>
      %59 = arith.subf %58, %57 : vector<8x512xf32>
      %60 = arith.mulf %56, %59 : vector<8x512xf32>
      %61 = arith.subf %42, %36 : vector<8x512xf32>
      %62 = arith.mulf %61, %60 : vector<8x512xf32>
      %63 = arith.subf %42, %38 : vector<8x512xf32>
      %64 = arith.mulf %63, %60 : vector<8x512xf32>
      %65 = arith.subf %42, %40 : vector<8x512xf32>
      %66 = arith.mulf %65, %60 : vector<8x512xf32>
      %67 = arith.cmpf oeq, %42, %36 : vector<8x512xf32>
      %68 = arith.subf %66, %64 : vector<8x512xf32>
      %cst_19 = arith.constant 0.000000e+00 : f32
      %69 = vector.broadcast %cst_19 : f32 to vector<8x512xf32>
      %70 = arith.select %67, %68, %69 : vector<8x512xi1>, vector<8x512xf32>
      %71 = arith.cmpf oeq, %42, %38 : vector<8x512xf32>
      %72 = arith.cmpf one, %42, %36 : vector<8x512xf32>
      %73 = arith.andi %71, %72 : vector<8x512xi1>
      %cst_20 = arith.constant 2.000000e+00 : f32
      %74 = vector.broadcast %cst_20 : f32 to vector<8x512xf32>
      %75 = arith.addf %74, %62 : vector<8x512xf32>
      %76 = arith.subf %75, %66 : vector<8x512xf32>
      %cst_21 = arith.constant 0.000000e+00 : f32
      %77 = vector.broadcast %cst_21 : f32 to vector<8x512xf32>
      %78 = arith.select %73, %76, %77 : vector<8x512xi1>, vector<8x512xf32>
      %79 = arith.cmpf one, %42, %38 : vector<8x512xf32>
      %80 = arith.cmpf one, %42, %36 : vector<8x512xf32>
      %81 = arith.andi %79, %80 : vector<8x512xi1>
      %cst_22 = arith.constant 4.000000e+00 : f32
      %82 = vector.broadcast %cst_22 : f32 to vector<8x512xf32>
      %83 = arith.addf %82, %64 : vector<8x512xf32>
      %84 = arith.subf %83, %62 : vector<8x512xf32>
      %cst_23 = arith.constant 0.000000e+00 : f32
      %85 = vector.broadcast %cst_23 : f32 to vector<8x512xf32>
      %86 = arith.select %81, %84, %85 : vector<8x512xi1>, vector<8x512xf32>
      %87 = arith.addf %70, %78 : vector<8x512xf32>
      %88 = arith.addf %87, %86 : vector<8x512xf32>
      %cst_24 = arith.constant 0.166666672 : f32
      %89 = vector.broadcast %cst_24 : f32 to vector<8x512xf32>
      %90 = arith.mulf %88, %89 : vector<8x512xf32>
      %cst_25 = arith.constant 1.000000e+00 : f32
      %91 = arith.addf %cst_25, %3 : f32
      %92 = vector.broadcast %91 : f32 to vector<8x512xf32>
      %93 = arith.addf %90, %92 : vector<8x512xf32>
      %94 = math.floor %93 : vector<8x512xf32>
      %95 = arith.subf %93, %94 : vector<8x512xf32>
      %cst_26 = arith.constant 6.000000e+00 : f32
      %96 = vector.broadcast %cst_26 : f32 to vector<8x512xf32>
      %97 = arith.mulf %95, %96 : vector<8x512xf32>
      %98 = math.floor %97 : vector<8x512xf32>
      %99 = arith.subf %97, %98 : vector<8x512xf32>
      %cst_27 = arith.constant 6.000000e+00 : f32
      %100 = vector.broadcast %cst_27 : f32 to vector<8x512xf32>
      %101 = arith.cmpf oge, %98, %100 : vector<8x512xf32>
      %cst_28 = arith.constant 6.000000e+00 : f32
      %102 = vector.broadcast %cst_28 : f32 to vector<8x512xf32>
      %103 = arith.subf %98, %102 : vector<8x512xf32>
      %104 = arith.select %101, %103, %98 : vector<8x512xi1>, vector<8x512xf32>
      %cst_29 = arith.constant 1.000000e+00 : f32
      %105 = vector.broadcast %cst_29 : f32 to vector<8x512xf32>
      %106 = arith.subf %105, %54 : vector<8x512xf32>
      %107 = arith.mulf %42, %106 : vector<8x512xf32>
      %cst_30 = arith.constant 0.000000e+00 : f32
      %cst_31 = arith.constant 1.000000e+00 : f32
      %108 = vector.broadcast %cst_30 : f32 to vector<8x512xf32>
      %109 = arith.maximumf %108, %107 : vector<8x512xf32>
      %110 = vector.broadcast %cst_31 : f32 to vector<8x512xf32>
      %111 = arith.minimumf %110, %109 : vector<8x512xf32>
      %112 = arith.mulf %54, %99 : vector<8x512xf32>
      %cst_32 = arith.constant 1.000000e+00 : f32
      %113 = vector.broadcast %cst_32 : f32 to vector<8x512xf32>
      %114 = arith.subf %113, %112 : vector<8x512xf32>
      %115 = arith.mulf %42, %114 : vector<8x512xf32>
      %cst_33 = arith.constant 0.000000e+00 : f32
      %cst_34 = arith.constant 1.000000e+00 : f32
      %116 = vector.broadcast %cst_33 : f32 to vector<8x512xf32>
      %117 = arith.maximumf %116, %115 : vector<8x512xf32>
      %118 = vector.broadcast %cst_34 : f32 to vector<8x512xf32>
      %119 = arith.minimumf %118, %117 : vector<8x512xf32>
      %cst_35 = arith.constant 1.000000e+00 : f32
      %120 = vector.broadcast %cst_35 : f32 to vector<8x512xf32>
      %121 = arith.subf %120, %99 : vector<8x512xf32>
      %122 = arith.mulf %54, %121 : vector<8x512xf32>
      %cst_36 = arith.constant 1.000000e+00 : f32
      %123 = vector.broadcast %cst_36 : f32 to vector<8x512xf32>
      %124 = arith.subf %123, %122 : vector<8x512xf32>
      %125 = arith.mulf %42, %124 : vector<8x512xf32>
      %cst_37 = arith.constant 0.000000e+00 : f32
      %cst_38 = arith.constant 1.000000e+00 : f32
      %126 = vector.broadcast %cst_37 : f32 to vector<8x512xf32>
      %127 = arith.maximumf %126, %125 : vector<8x512xf32>
      %128 = vector.broadcast %cst_38 : f32 to vector<8x512xf32>
      %129 = arith.minimumf %128, %127 : vector<8x512xf32>
      %cst_39 = arith.constant 0.000000e+00 : f32
      %130 = vector.broadcast %cst_39 : f32 to vector<8x512xf32>
      %131 = arith.cmpf oeq, %104, %130 : vector<8x512xf32>
      %132 = arith.select %131, %42, %42 : vector<8x512xi1>, vector<8x512xf32>
      %cst_40 = arith.constant 1.000000e+00 : f32
      %133 = vector.broadcast %cst_40 : f32 to vector<8x512xf32>
      %134 = arith.cmpf oeq, %104, %133 : vector<8x512xf32>
      %135 = arith.select %134, %119, %132 : vector<8x512xi1>, vector<8x512xf32>
      %cst_41 = arith.constant 2.000000e+00 : f32
      %136 = vector.broadcast %cst_41 : f32 to vector<8x512xf32>
      %137 = arith.cmpf oeq, %104, %136 : vector<8x512xf32>
      %138 = arith.select %137, %111, %135 : vector<8x512xi1>, vector<8x512xf32>
      %cst_42 = arith.constant 3.000000e+00 : f32
      %139 = vector.broadcast %cst_42 : f32 to vector<8x512xf32>
      %140 = arith.cmpf oeq, %104, %139 : vector<8x512xf32>
      %141 = arith.select %140, %111, %138 : vector<8x512xi1>, vector<8x512xf32>
      %cst_43 = arith.constant 4.000000e+00 : f32
      %142 = vector.broadcast %cst_43 : f32 to vector<8x512xf32>
      %143 = arith.cmpf oeq, %104, %142 : vector<8x512xf32>
      %144 = arith.select %143, %129, %141 : vector<8x512xi1>, vector<8x512xf32>
      %cst_44 = arith.constant 0.000000e+00 : f32
      %145 = vector.broadcast %cst_44 : f32 to vector<8x512xf32>
      %146 = arith.cmpf oeq, %104, %145 : vector<8x512xf32>
      %147 = arith.select %146, %129, %111 : vector<8x512xi1>, vector<8x512xf32>
      %cst_45 = arith.constant 1.000000e+00 : f32
      %148 = vector.broadcast %cst_45 : f32 to vector<8x512xf32>
      %149 = arith.cmpf oeq, %104, %148 : vector<8x512xf32>
      %150 = arith.select %149, %42, %147 : vector<8x512xi1>, vector<8x512xf32>
      %cst_46 = arith.constant 2.000000e+00 : f32
      %151 = vector.broadcast %cst_46 : f32 to vector<8x512xf32>
      %152 = arith.cmpf oeq, %104, %151 : vector<8x512xf32>
      %153 = arith.select %152, %42, %150 : vector<8x512xi1>, vector<8x512xf32>
      %cst_47 = arith.constant 3.000000e+00 : f32
      %154 = vector.broadcast %cst_47 : f32 to vector<8x512xf32>
      %155 = arith.cmpf oeq, %104, %154 : vector<8x512xf32>
      %156 = arith.select %155, %119, %153 : vector<8x512xi1>, vector<8x512xf32>
      %cst_48 = arith.constant 4.000000e+00 : f32
      %157 = vector.broadcast %cst_48 : f32 to vector<8x512xf32>
      %158 = arith.cmpf oeq, %104, %157 : vector<8x512xf32>
      %159 = arith.select %158, %111, %156 : vector<8x512xi1>, vector<8x512xf32>
      %cst_49 = arith.constant 0.000000e+00 : f32
      %160 = vector.broadcast %cst_49 : f32 to vector<8x512xf32>
      %161 = arith.cmpf oeq, %104, %160 : vector<8x512xf32>
      %162 = arith.select %161, %111, %119 : vector<8x512xi1>, vector<8x512xf32>
      %cst_50 = arith.constant 1.000000e+00 : f32
      %163 = vector.broadcast %cst_50 : f32 to vector<8x512xf32>
      %164 = arith.cmpf oeq, %104, %163 : vector<8x512xf32>
      %165 = arith.select %164, %111, %162 : vector<8x512xi1>, vector<8x512xf32>
      %cst_51 = arith.constant 2.000000e+00 : f32
      %166 = vector.broadcast %cst_51 : f32 to vector<8x512xf32>
      %167 = arith.cmpf oeq, %104, %166 : vector<8x512xf32>
      %168 = arith.select %167, %129, %165 : vector<8x512xi1>, vector<8x512xf32>
      %cst_52 = arith.constant 3.000000e+00 : f32
      %169 = vector.broadcast %cst_52 : f32 to vector<8x512xf32>
      %170 = arith.cmpf oeq, %104, %169 : vector<8x512xf32>
      %171 = arith.select %170, %42, %168 : vector<8x512xi1>, vector<8x512xf32>
      %cst_53 = arith.constant 4.000000e+00 : f32
      %172 = vector.broadcast %cst_53 : f32 to vector<8x512xf32>
      %173 = arith.cmpf oeq, %104, %172 : vector<8x512xf32>
      %174 = arith.select %173, %42, %171 : vector<8x512xi1>, vector<8x512xf32>
      %c0_54 = arith.constant 0 : index
      %c0_55 = arith.constant 0 : index
      %c0_56 = arith.constant 0 : index
      %c0_57 = arith.constant 0 : index
      %175 = vector.load %arg5[%c0_54, %c0_55, %c0_56, %c0_57] : memref<1x3x8x512xf32, #tpu.memory_space<vmem>>, vector<1x1x8x512xf32>
      %176 = vector.shape_cast %175 : vector<1x1x8x512xf32> to vector<8x512xf32>
      %177 = vector.shape_cast %144 : vector<8x512xf32> to vector<1x1x8x512xf32>
      tpu.vector_store %arg5[%c0_54, %c0_55, %c0_56, %c0_57], %177 {strides = array<i32>} : memref<1x3x8x512xf32, #tpu.memory_space<vmem>>, vector<1x1x8x512xf32>,
      %c0_58 = arith.constant 0 : index
      %c1_59 = arith.constant 1 : index
      %c0_60 = arith.constant 0 : index
      %c0_61 = arith.constant 0 : index
      %178 = vector.load %arg5[%c0_58, %c1_59, %c0_60, %c0_61] : memref<1x3x8x512xf32, #tpu.memory_space<vmem>>, vector<1x1x8x512xf32>
      %179 = vector.shape_cast %178 : vector<1x1x8x512xf32> to vector<8x512xf32>
      %180 = vector.shape_cast %159 : vector<8x512xf32> to vector<1x1x8x512xf32>
      tpu.vector_store %arg5[%c0_58, %c1_59, %c0_60, %c0_61], %180 {strides = array<i32>} : memref<1x3x8x512xf32, #tpu.memory_space<vmem>>, vector<1x1x8x512xf32>,
      %c0_62 = arith.constant 0 : index
      %c2_63 = arith.constant 2 : index
      %c0_64 = arith.constant 0 : index
      %c0_65 = arith.constant 0 : index
      %181 = vector.load %arg5[%c0_62, %c2_63, %c0_64, %c0_65] : memref<1x3x8x512xf32, #tpu.memory_space<vmem>>, vector<1x1x8x512xf32>
      %182 = vector.shape_cast %181 : vector<1x1x8x512xf32> to vector<8x512xf32>
      %183 = vector.shape_cast %174 : vector<8x512xf32> to vector<1x1x8x512xf32>
      tpu.vector_store %arg5[%c0_62, %c2_63, %c0_64, %c0_65], %183 {strides = array<i32>} : memref<1x3x8x512xf32, #tpu.memory_space<vmem>>, vector<1x1x8x512xf32>,
    } else {
    }
    %cst_9 = arith.constant 5.000000e-01 : f32
    %28 = arith.cmpf ole, %8, %cst_9 : f32
    %cst_10 = arith.constant 5.000000e-01 : f32
    %29 = arith.cmpf ogt, %5, %cst_10 : f32
    %30 = arith.andi %28, %29 : i1
    %31 = arith.extui %30 : i1 to i32
    %c0_i32_11 = arith.constant 0 : i32
    %32 = arith.cmpi ne, %31, %c0_i32_11 : i32
    scf.if %32 {
      %c0_12 = arith.constant 0 : index
      %c0_13 = arith.constant 0 : index
      %c0_14 = arith.constant 0 : index
      %c0_15 = arith.constant 0 : index
      %33 = vector.load %arg5[%c0_12, %c0_13, %c0_14, %c0_15] : memref<1x3x8x512xf32, #tpu.memory_space<vmem>>, vector<1x3x8x512xf32>
      %34 = vector.shape_cast %33 : vector<1x3x8x512xf32> to vector<3x8x512xf32>
      %35 = vector.broadcast %1 : f32 to vector<3x8x512xf32>
      %36 = arith.mulf %35, %34 : vector<3x8x512xf32>
      %cst_16 = arith.constant 1.000000e+00 : f32
      %37 = arith.subf %cst_16, %1 : f32
      %38 = arith.mulf %37, %10 : f32
      %39 = vector.broadcast %38 : f32 to vector<3x8x512xf32>
      %40 = arith.addf %36, %39 : vector<3x8x512xf32>
      %cst_17 = arith.constant 0.000000e+00 : f32
      %cst_18 = arith.constant 1.000000e+00 : f32
      %41 = vector.broadcast %cst_17 : f32 to vector<3x8x512xf32>
      %42 = arith.maximumf %41, %40 : vector<3x8x512xf32>
      %43 = vector.broadcast %cst_18 : f32 to vector<3x8x512xf32>
      %44 = arith.minimumf %43, %42 : vector<3x8x512xf32>
      %c0_19 = arith.constant 0 : index
      %c0_20 = arith.constant 0 : index
      %c0_21 = arith.constant 0 : index
      %c0_22 = arith.constant 0 : index
      %45 = vector.load %arg5[%c0_19, %c0_20, %c0_21, %c0_22] : memref<1x3x8x512xf32, #tpu.memory_space<vmem>>, vector<1x3x8x512xf32>
      %46 = vector.shape_cast %45 : vector<1x3x8x512xf32> to vector<3x8x512xf32>
      %47 = vector.shape_cast %44 : vector<3x8x512xf32> to vector<1x3x8x512xf32>
      tpu.vector_store %arg5[%c0_19, %c0_20, %c0_21, %c0_22], %47 {strides = array<i32>} : memref<1x3x8x512xf32, #tpu.memory_space<vmem>>, vector<1x3x8x512xf32>,
    } else {
    }
    return
  }
  func.func @transform_0(%arg0: i32, %arg1: i32, %arg2: memref<9xf32, #tpu.memory_space<smem>>, %arg3: memref<2xf32, #tpu.memory_space<smem>>) -> (i32, i32, i32, i32) {
    %c0_i32 = arith.constant 0 : i32
    %c0_i32_0 = arith.constant 0 : i32
    %c0_i32_1 = arith.constant 0 : i32
    return %arg0, %c0_i32, %arg1, %c0_i32_0 : i32, i32, i32, i32
  }
  func.func @transform_1(%arg0: i32, %arg1: i32, %arg2: memref<9xf32, #tpu.memory_space<smem>>, %arg3: memref<2xf32, #tpu.memory_space<smem>>) -> (i32, i32, i32, i32) {
    %c0_i32 = arith.constant 0 : i32
    %c0_i32_0 = arith.constant 0 : i32
    %c0_i32_1 = arith.constant 0 : i32
    return %arg0, %c0_i32, %arg1, %c0_i32_0 : i32, i32, i32, i32
  }
}

</mosaic_0001>

<bundles_post_ra>
// kernel: tpu_custom_call.1
= control target key start
LH: loop header
LB: loop body
LE: loop exit
PB: predicated region body
PF: predicated region fallthrough
CT: control target
= control target key end

     0   :  { %s2089_s0 = inlined_call_operand.hbm [shape: f32[9], index: 0, kind: input, shape index: {}]   ;;  %s2090_s2 = inlined_call_operand.hbm [shape: f32[2,3,8,512], index: 2, kind: input, shape index: {}]   ;;  %s2091_s3 = inlined_call_operand.hbm [shape: f32[2,3,8,512], index: 3, kind: output, shape index: {}]   ;;  %s2092_s1 = inlined_call_operand.vmem [shape: f32[2], index: 1, kind: input, shape index: {}]  }
   0x1   :  { %s1116_s14 = scalar_lea.hbm %s2089_s0, 16 }
   0x2   :  { %p1117_p0 = scmp.ne.s32.totalorder %s2089_s0, %s1116_s14  ;;  %p1120_p1 = scmp.lt.u32.totalorder %s1116_s14, %s2089_s0 }
   0x4   :  { %p1122_p2 = pnand %p1120_p1, %p1117_p0 }
   0x6   :  { %1125 = shalt.err (!%p1122_p2)  }
   0x7   :  { %s1254_s19 = smov [#allocation3]   ;;  %s10_s24 = sshll.u32 %s2092_s1, 4  ;;  %s11_s24 = int_to_ptr.vmem [resolvable:$true] %s10_s24 }
   0x8   :  { %9 = dma.hbm_to_smem %s2089_s0, 16, %s1254_s19, [#allocation2] }
   0x9   :  { %s1126_s25 = scalar_lea.vmem %s11_s24, 16  ;;  %p1131_p4 = scmp.lt.s32.totalorder %s11_s24, %s11_s24 }
   0xa   :  { %p1127_p3 = scmp.ne.s32.totalorder %s11_s24, %s1126_s25  ;;  %p1132_p5 = scmp.lt.s32.totalorder %s1126_s25, %s1126_s25 }
   0xc   :  { %p1133_p6 = por %p1132_p5, %p1131_p4 }
   0xe   :  { %p1134_p7 = pnand %p1133_p6, %p1127_p3 }
  0x10   :  { %1137 = shalt.err (!%p1134_p7)  }
  0x11   :  { %s1255_s26 = smov [#allocation4]  }
  0x12   :  { %13 = dma.vmem_to_smem %s11_s24, 16, %s1255_s26, [#allocation2] }
  0x13   :  { %1220 = dma.done.wait [#allocation2], 32 }
  0x14   :  { %1221 = vsyncadd [#allocation2], 4294967264 }
  0x15   :  { %15 = sfence }
  0x16   :  { %16 = vsyncpa [#allocation6], 0 }
  0x17   :  { %18 = vsyncpa [#allocation6 + $0x1], 0 }
  0x18   :  { %19 = vsyncpa [#allocation7], 0 }
  0x19   :  { %21 = vsyncpa [#allocation7 + $0x1], 0  ;;  %s1297_s0 = smov 0   ;;  %s1299_s1 = smov 0  }
  0x1a   :  { %s1301_s27 = smov 0   ;;  %s1303_s28 = smov 0  }
  0x1b   :  { %s1305_s29 = smov 0   ;;  %s1307_s30 = smov 0  }
  0x1c LB: > { %s999_s4 = sadd.s32 4294967295, %s1252_s30   ;;  %s1000_s5 = sadd.s32 4294967294, %s1252_s30   ;;  %s1252_s30 = sphi %s1307_s30, %s27_s30   ;;  %s1248_s29 = sphi %s1305_s29, %s2115_s29   ;;  %s1244_s28 = sphi %s1303_s28, %s2114_s28   ;;  %s1240_s27 = sphi %s1301_s27, %s2113_s27   ;;  %s1236_s1 = sphi %s1299_s1, %s2112_s1   ;;  %s1232_s0 = sphi %s1297_s0, %s2111_s0  }
  0x1d   : > { %s39_s6 = sadd.s32 1, %s1248_s29  ;;  %s48_s7 = sadd.s32 1, %s1240_s27 }
  0x1e   : > { %p41_p8 = scmp.ge.s32.totalorder %s39_s6, 2  ;;  %p55_p9 = scmp.ne.s32.totalorder %s1240_s27, %s1236_s1 }
  0x1f   : > { %p56_p10 = scmp.eq.s32.totalorder %s1252_s30, 0  ;;  %p61_p11 = scmp.ne.s32.totalorder %s1236_s1, %s1232_s0 }
  0x20   : > { %s2117_s6 = smov (%p41_p8, %s39_s6), 0  ;;  %p62_p13 = scmp.eq.s32.totalorder %s999_s4, 0 }
  0x21   : > { %p1338_p12 = por %p56_p10, %p55_p9  ;;  %s43_s9 = ssub.s32 %s1248_s29, %s2117_s6 }
  0x22   : > { %p87_p0 = scmp.eq.s32.totalorder %s999_s4, 1  ;;  %p46_p1 = scmp.eq.s32.totalorder %s43_s9, 0 }
  0x23   : > { %p1344_p2 = por %p62_p13, %p61_p11  ;;  %p93_p4 = scmp.eq.s32.totalorder %s1000_s5, 1 }
  0x24   : > { %p1348_p3 = por %p87_p0, %p55_p9  ;;  %p1044_p7 = scmp.lt.s32.totalorder %s1252_s30, 2 }
  0x25   : > { %s1353_s12 = scalar_select %p46_p1, %s1240_s27, %s48_s7  }
  0x26   : > { %s2096_s11 = scalar_select %p1348_p3, 1, 0 }
  0x27   : > { %p1355_p5 = por %p93_p4, %p61_p11  ;;  %s113_s14 = sand.u32 1, %s1240_s27  }
  0x28   : > { %s1028_s15 = smul.u32 96, %s113_s14  ;;  %p1365_p8 = pnand %p1044_p7, %p1338_p12 }
  0x29   : > { %s2097_s13 = scalar_select %p1355_p5, 1, 0 }
  0x2a   : > { %s1029_s16 = smul.u32 1536, %s1248_s29  ;;  %s117_s21 = scalar_lea.vmem [#allocation5], %s1028_s15 }
  0x2b   : > { %s126_s22 = sshll.u32 %s117_s21, 4  ;;  %s1377_s23 = scalar_lea.sflag [#allocation6], %s113_s14  ;;  %s1374_s22 = int_to_ptr.vmem [resolvable:$true] %s126_s22 }
  0x2c   : > { %s1372_s20 = scalar_lea.hbm %s2090_s2, %s1029_s16  ;;  %p1140_p11 = pneg %p1365_p8 }
  0x2d   : > { %s1138_s24 = scalar_lea.hbm %s1372_s20, 1536  ;;  %s1143_s4 = scalar_lea.hbm %s2090_s2, 3072 }
  0x2e   : > { %p1139_p10 = scmp.ne.s32.totalorder %s1372_s20, %s1138_s24  ;;  %p1144_p0 = scmp.lt.u32.totalorder %s1372_s20, %s2090_s2 }
  0x2f   : > { %p1145_p1 = scmp.lt.u32.totalorder %s1143_s4, %s1138_s24  ;;  %p1147_p7 = scmp.lt.u32.totalorder %s1138_s24, %s1372_s20 }
  0x30   : > { %p1141_p12 = pnand %p1140_p11, %p1139_p10 }
  0x31   : > { %p1146_p4 = por %p1145_p1, %p1144_p0 }
  0x32   : > { %p1142_p13 = pneg %p1141_p12 }
  0x33   : > { %p1148_p6 = por %p1147_p7, %p1146_p4 }
  0x35   : > { %p1149_p9 = pnand %p1148_p6, %p1142_p13 }
  0x37   : > { %1152 = shalt.err (!%p1149_p9)
}
  0x38   : > { %s1153_s8 = scalar_lea.vmem %s1374_s22, 1536  ;;  %s1256_s9 = smov [#allocation5]  }
  0x39   : > { %p1154_p10 = scmp.ne.s32.totalorder %s1374_s22, %s1153_s8  ;;  %s1158_s14 = sshll.u32 %s1256_s9, 4  ;;  %s1159_s14 = int_to_ptr.vmem [resolvable:$false] %s1158_s14 }
  0x3a   : > { %s1160_s15 = scalar_lea.vmem %s1159_s14, 3072  ;;  %p1161_p3 = scmp.lt.s32.totalorder %s1374_s22, %s1159_s14 }
  0x3b   : > { %p1156_p12 = pnand %p1154_p10, %p1140_p11  ;;  %p1162_p0 = scmp.lt.s32.totalorder %s1160_s15, %s1153_s8 }
  0x3d   : > { %p1157_p5 = pneg %p1156_p12  ;;  %p1163_p1 = por %p1162_p0, %p1161_p3 }
  0x3f   : > { %p1164_p4 = pnand %p1163_p1, %p1157_p5 }
  0x41   : > { %1167 = shalt.err (!%p1164_p4)
}
  0x42   : > { %s1257_s16 = smov 512   ;;  %s1258_s18 = smov 32  }
  0x43   : > { %1039 = dma.hbm_to_vmem [thread:$0]  (!%p1365_p8), %s1372_s20, 1536, %s1374_s22, %s1377_s23, %s1257_s16, %s1257_s16, %s1258_s18  }
  0x44   : > { %p134_p6 = scmp.lt.s32.totalorder %s1252_s30, 3  ;;  %p2099_p9 = scmp.ge.s32.totalorder %s1252_s30, 1 }
  0x46   : > { %p135_p11 = pnand %p2099_p9, %p134_p6 }
  0x47   : > { %s1409_s19 = sand.u32 (!%p135_p11), 1, %s1236_s1  }
  0x48   : > { %138 = sbr.rel (%p135_p11) target bundleno = 301 (0x12d), region = 24  ;;  %s141_s24 = scalar_lea.sflag (!%p135_p11), [#allocation6], %s1409_s19 }
  0x49   : > { %s1030_s21 = smul.u32 (!%p135_p11), 96, %s1409_s19 }
  0x4b   : > { %s1413_s25 = scalar_lea.vmem (!%p135_p11), [#allocation5], %s1030_s21 }
  0x4f   : > { %1223 = dma.done.wait (%p1344_p2), %s141_s24, 1536  }
  0x50   : > { %1225 = vsyncadd (%p1344_p2), %s141_s24, 4294965760  ;;  %s163_s17 = sld [smem:[#allocation3]]  ;;  %s1419_s20 = sld [smem:[#allocation3 + $0x1]] }
  0x51   : > { %s1421_s22 = sld [smem:[#allocation3 + $0x2]]  ;;  %s1423_s23 = sld [smem:[#allocation3 + $0x3]] }
  0x52   : > { %s1425_s26 = sld [smem:[#allocation3 + $0x4]]  ;;  %s1427_s4 = sld [smem:[#allocation3 + $0x5]] }
  0x53   : > { %s1429_s5 = sld [smem:[#allocation3 + $0x6]]  ;;  %s1431_s7 = sld [smem:[#allocation3 + $0x7]] }
  0x54   : > { %s1433_s8 = sld [smem:[#allocation3 + $0x8]]  ;;  %s1439_s9 = scalar_lea.vmem [#allocation8], %s1030_s21 }
  0x55   : > { %s1436_s10 = sld [smem:[#allocation4 + %s1244_s28]] }
  0x58   : > { %p173_p2 = scmp.gt.f32.partialorder %s1425_s26, 0.5 }
  0x59   : > { %v177_v0 = vld [vmem:[%s1413_s25] sm:$0xff] (%p173_p2)  ;;  %v189_v1 = vstv (%p173_p2), %s163_s17  ;;  %v178_v2 = vld [vmem:[%s1413_s25 + $0x8] sm:$0xff] (%p173_p2)  ;;  %v179_v3 = vld [vmem:[%s1413_s25 + $0x10] sm:$0xff] (%p173_p2) }
  0x5a   : > { %176 = sbr.rel (!%p173_p2) target bundleno = 104 (0x68), region = 32  ;;  %v190_v4 = vmul.f32 (%p173_p2), %v189_v1, %v177_v0  ;;  %v191_v5 = vmul.f32 (%p173_p2), %v189_v1, %v178_v2  ;;  %v192_v6 = vmul.f32 (%p173_p2), %v189_v1, %v179_v3  ;;  %v180_v7 = vld [vmem:[%s1413_s25 + $0x18] sm:$0xff] (%p173_p2)  ;;  %v181_v8 = vld [vmem:[%s1413_s25 + $0x20] sm:$0xff] (%p173_p2)  ;;  %v182_v9 = vld [vmem:[%s1413_s25 + $0x28] sm:$0xff] (%p173_p2) }
  0x5b   : > { %v193_v10 = vmul.f32 (%p173_p2), %v189_v1, %v180_v7  ;;  %v194_v11 = vmul.f32 (%p173_p2), %v189_v1, %v181_v8  ;;  %v195_v12 = vmul.f32 (%p173_p2), %v189_v1, %v182_v9  ;;  %v183_v13 = vld [vmem:[%s1413_s25 + $0x30] sm:$0xff] (%p173_p2)  ;;  %v184_v14 = vld [vmem:[%s1413_s25 + $0x38] sm:$0xff] (%p173_p2)  ;;  %v185_v23 = vld [vmem:[%s1413_s25 + $0x40] sm:$0xff] (%p173_p2) }
  0x5c   : > { %v202_v15 = vmax.f32 (%p173_p2), %v190_v4, 0.0  ;;  %v203_v16 = vmax.f32 (%p173_p2), %v191_v5, 0.0  ;;  %v204_v17 = vmax.f32 (%p173_p2), %v192_v6, 0.0  ;;  %v196_v18 = vmul.f32 (%p173_p2), %v189_v1, %v183_v13  ;;  %v186_v24 = vld [vmem:[%s1413_s25 + $0x48] sm:$0xff] (%p173_p2)  ;;  %v187_v25 = vld [vmem:[%s1413_s25 + $0x50] sm:$0xff] (%p173_p2)  ;;  %v188_v30 = vld [vmem:[%s1413_s25 + $0x58] sm:$0xff] (%p173_p2) }
  0x5d   : > { %v205_v19 = vmax.f32 (%p173_p2), %v193_v10, 0.0  ;;  %v206_v20 = vmax.f32 (%p173_p2), %v194_v11, 0.0  ;;  %v207_v21 = vmax.f32 (%p173_p2), %v195_v12, 0.0  ;;  %v197_v22 = vmul.f32 (%p173_p2), %v189_v1, %v184_v14 }
  0x5e   : > { %v214_v26 = vmin.f32 (%p173_p2), %v202_v15, 1.0  ;;  %v215_v27 = vmin.f32 (%p173_p2), %v203_v16, 1.0  ;;  %v216_v28 = vmin.f32 (%p173_p2), %v204_v17, 1.0  ;;  %v208_v29 = vmax.f32 (%p173_p2), %v196_v18, 0.0 }
  0x5f   : > { %v217_v31 = vmin.f32 (%p173_p2), %v205_v19, 1.0  ;;  %v218_v32 = vmin.f32 (%p173_p2), %v206_v20, 1.0  ;;  %v219_v33 = vmin.f32 (%p173_p2), %v207_v21, 1.0  ;;  %v209_v34 = vmax.f32 (%p173_p2), %v197_v22, 0.0 }
  0x60   : > { %226 = vst [vmem:[%s1439_s9] sm:$0xff] (%p173_p2), %v214_v26  ;;  %227 = vst [vmem:[%s1439_s9 + $0x8] sm:$0xff] (%p173_p2), %v215_v27  ;;  %v220_v35 = vmin.f32 (%p173_p2), %v208_v29, 1.0  ;;  %v198_v36 = vmul.f32 (%p173_p2), %v189_v1, %v185_v23  ;;  %v199_v37 = vmul.f32 (%p173_p2), %v189_v1, %v186_v24  ;;  %v200_v38 = vmul.f32 (%p173_p2), %v189_v1, %v187_v25 }
  0x61   : > { %228 = vst [vmem:[%s1439_s9 + $0x10] sm:$0xff] %v216_v28  ;;  %229 = vst [vmem:[%s1439_s9 + $0x18] sm:$0xff] %v217_v31  ;;  %v221_v39 = vmin.f32 %v209_v34, 1.0  ;;  %v201_v40 = vmul.f32 %v189_v1, %v188_v30 }
  0x62   : > { %230 = vst [vmem:[%s1439_s9 + $0x20] sm:$0xff] %v218_v32  ;;  %231 = vst [vmem:[%s1439_s9 + $0x28] sm:$0xff] %v219_v33  ;;  %v210_v41 = vmax.f32 %v198_v36, 0.0  ;;  %v211_v42 = vmax.f32 %v199_v37, 0.0  ;;  %v212_v43 = vmax.f32 %v200_v38, 0.0 }
  0x63   : > { %232 = vst [vmem:[%s1439_s9 + $0x30] sm:$0xff] %v220_v35  ;;  %233 = vst [vmem:[%s1439_s9 + $0x38] sm:$0xff] %v221_v39  ;;  %v213_v44 = vmax.f32 %v201_v40, 0.0 }
  0x64   : > { %v222_v45 = vmin.f32 %v210_v41, 1.0  ;;  %v223_v46 = vmin.f32 %v211_v42, 1.0  ;;  %v224_v47 = vmin.f32 %v212_v43, 1.0 }
  0x65   : > { %v225_v48 = vmin.f32 %v213_v44, 1.0 }
  0x66   : > { %234 = vst [vmem:[%s1439_s9 + $0x40] sm:$0xff] %v222_v45  ;;  %235 = vst [vmem:[%s1439_s9 + $0x48] sm:$0xff] %v223_v46 }
  0x67   : > { %236 = vst [vmem:[%s1439_s9 + $0x50] sm:$0xff] %v224_v47  ;;  %237 = vst [vmem:[%s1439_s9 + $0x58] sm:$0xff] %v225_v48 }
  0x68 PF: > { %p238_p3 = scmp.le.f32.partialorder %s1425_s26, 0.5 }
  0x69   : > { %v242_v49 = vld [vmem:[%s1413_s25] sm:$0xff] (%p238_p3)  ;;  %v243_v50 = vld [vmem:[%s1413_s25 + $0x8] sm:$0xff] (%p238_p3)  ;;  %v244_v51 = vld [vmem:[%s1413_s25 + $0x10] sm:$0xff] (%p238_p3) }
  0x6a   : > { %241 = sbr.rel (!%p238_p3) target bundleno = 113 (0x71), region = 36  ;;  %254 = vst [vmem:[%s1439_s9] sm:$0xff] (%p238_p3), %v242_v49  ;;  %255 = vst [vmem:[%s1439_s9 + $0x8] sm:$0xff] (%p238_p3), %v243_v50  ;;  %v245_v52 = vld [vmem:[%s1413_s25 + $0x18] sm:$0xff] (%p238_p3)  ;;  %v246_v53 = vld [vmem:[%s1413_s25 + $0x20] sm:$0xff] (%p238_p3) }
  0x6b   : > { %256 = vst [vmem:[%s1439_s9 + $0x10] sm:$0xff] (%p238_p3), %v244_v51  ;;  %v247_v54 = vld [vmem:[%s1413_s25 + $0x28] sm:$0xff] (%p238_p3)  ;;  %257 = vst [vmem:[%s1439_s9 + $0x18] sm:$0xff] (%p238_p3), %v245_v52  ;;  %v248_v55 = vld [vmem:[%s1413_s25 + $0x30] sm:$0xff] (%p238_p3) }
  0x6c   : > { %258 = vst [vmem:[%s1439_s9 + $0x20] sm:$0xff] (%p238_p3), %v246_v53  ;;  %259 = vst [vmem:[%s1439_s9 + $0x28] sm:$0xff] (%p238_p3), %v247_v54  ;;  %v249_v56 = vld [vmem:[%s1413_s25 + $0x38] sm:$0xff] (%p238_p3)  ;;  %v250_v57 = vld [vmem:[%s1413_s25 + $0x40] sm:$0xff] (%p238_p3) }
  0x6d   : > { %260 = vst [vmem:[%s1439_s9 + $0x30] sm:$0xff] (%p238_p3), %v248_v55  ;;  %261 = vst [vmem:[%s1439_s9 + $0x38] sm:$0xff] (%p238_p3), %v249_v56  ;;  %v251_v58 = vld [vmem:[%s1413_s25 + $0x48] sm:$0xff] (%p238_p3)  ;;  %v252_v59 = vld [vmem:[%s1413_s25 + $0x50] sm:$0xff] (%p238_p3) }
  0x6e   : > { %262 = vst [vmem:[%s1439_s9 + $0x40] sm:$0xff] (%p238_p3), %v250_v57  ;;  %v253_v60 = vld [vmem:[%s1413_s25 + $0x58] sm:$0xff] (%p238_p3)  ;;  %263 = vst [vmem:[%s1439_s9 + $0x48] sm:$0xff] (%p238_p3), %v251_v58 }
  0x6f   : > { %264 = vst [vmem:[%s1439_s9 + $0x50] sm:$0xff] (%p238_p3), %v252_v59  ;;  %265 = vst [vmem:[%s1439_s9 + $0x58] sm:$0xff] (%p238_p3), %v253_v60 }
  0x71 PF: > { %p266_p5 = scmp.gt.f32.partialorder %s1433_s8, 0.5  ;;  %p267_p8 = scmp.gt.f32.partialorder %s1427_s4, 0.5 }
  0x73   : > { %p268_p13 = pnand %p267_p8, %p266_p5 }
  0x74   : > { %v272_v61 = vld [vmem:[%s1439_s9] sm:$0xff] (!%p268_p13)  ;;  %v284_v62 = vstv (!%p268_p13), %s1419_s20  ;;  %s297_s14 = ssub.f32 (!%p268_p13), 1.0, %s1419_s20  ;;  %v273_v63 = vld [vmem:[%s1439_s9 + $0x8] sm:$0xff] (!%p268_p13)  ;;  %v274_v0 = vld [vmem:[%s1439_s9 + $0x10] sm:$0xff] (!%p268_p13) }
  0x75   : > { %271 = sbr.rel (%p268_p13) target bundleno = 135 (0x87), region = 40  ;;  %v285_v1 = vmul.f32 (!%p268_p13), %v284_v62, %v272_v61  ;;  %v286_v2 = vmul.f32 (!%p268_p13), %v284_v62, %v273_v63  ;;  %v287_v3 = vmul.f32 (!%p268_p13), %v284_v62, %v274_v0  ;;  %v275_v4 = vld [vmem:[%s1439_s9 + $0x18] sm:$0xff] (!%p268_p13)  ;;  %v276_v5 = vld [vmem:[%s1439_s9 + $0x20] sm:$0xff] (!%p268_p13)  ;;  %v277_v6 = vld [vmem:[%s1439_s9 + $0x28] sm:$0xff] (!%p268_p13) }
  0x76   : > { %s298_s15 = smul.f32 (!%p268_p13), %s297_s14, %s1436_s10  ;;  %v288_v7 = vmul.f32 (!%p268_p13), %v284_v62, %v275_v4  ;;  %v289_v8 = vmul.f32 (!%p268_p13), %v284_v62, %v276_v5  ;;  %v290_v9 = vmul.f32 (!%p268_p13), %v284_v62, %v277_v6  ;;  %v278_v10 = vld [vmem:[%s1439_s9 + $0x30] sm:$0xff] (!%p268_p13)  ;;  %v279_v11 = vld [vmem:[%s1439_s9 + $0x38] sm:$0xff] (!%p268_p13)  ;;  %v280_v12 = vld [vmem:[%s1439_s9 + $0x40] sm:$0xff] (!%p268_p13) }
  0x77   : > { %v291_v13 = vmul.f32 (!%p268_p13), %v284_v62, %v278_v10  ;;  %v292_v14 = vmul.f32 (!%p268_p13), %v284_v62, %v279_v11  ;;  %v293_v15 = vmul.f32 (!%p268_p13), %v284_v62, %v280_v12  ;;  %v281_v16 = vld [vmem:[%s1439_s9 + $0x48] sm:$0xff] (!%p268_p13)  ;;  %v282_v17 = vld [vmem:[%s1439_s9 + $0x50] sm:$0xff] (!%p268_p13)  ;;  %v283_v18 = vld [vmem:[%s1439_s9 + $0x58] sm:$0xff] (!%p268_p13) }
  0x78   : > { %v299_v19 = vstv (!%p268_p13), %s298_s15  ;;  %v294_v20 = vmul.f32 (!%p268_p13), %v284_v62, %v281_v16  ;;  %v295_v21 = vmul.f32 (!%p268_p13), %v284_v62, %v282_v17  ;;  %v296_v22 = vmul.f32 (!%p268_p13), %v284_v62, %v283_v18 }
  0x79   : > { %v300_v23 = vadd.f32 (!%p268_p13), %v299_v19, %v285_v1  ;;  %v301_v24 = vadd.f32 (!%p268_p13), %v299_v19, %v286_v2  ;;  %v302_v25 = vadd.f32 (!%p268_p13), %v299_v19, %v287_v3  ;;  %v303_v26 = vadd.f32 (!%p268_p13), %v299_v19, %v288_v7 }
  0x7a   : > { %v304_v27 = vadd.f32 (!%p268_p13), %v299_v19, %v289_v8  ;;  %v305_v28 = vadd.f32 (!%p268_p13), %v299_v19, %v290_v9  ;;  %v306_v29 = vadd.f32 (!%p268_p13), %v299_v19, %v291_v13  ;;  %v307_v30 = vadd.f32 (!%p268_p13), %v299_v19, %v292_v14 }
  0x7b   : > { %v312_v31 = vmax.f32 (!%p268_p13), %v300_v23, 0.0  ;;  %v313_v32 = vmax.f32 (!%p268_p13), %v301_v24, 0.0  ;;  %v314_v33 = vmax.f32 (!%p268_p13), %v302_v25, 0.0  ;;  %v315_v34 = vmax.f32 (!%p268_p13), %v303_v26, 0.0 }
  0x7c   : > { %v316_v35 = vmax.f32 %v304_v27, 0.0  ;;  %v317_v36 = vmax.f32 %v305_v28, 0.0  ;;  %v318_v37 = vmax.f32 %v306_v29, 0.0  ;;  %v319_v38 = vmax.f32 %v307_v30, 0.0 }
  0x7d   : > { %v324_v39 = vmin.f32 %v312_v31, 1.0  ;;  %v325_v40 = vmin.f32 %v313_v32, 1.0  ;;  %v326_v41 = vmin.f32 %v314_v33, 1.0  ;;  %v327_v42 = vmin.f32 %v315_v34, 1.0 }
  0x7e   : > { %v328_v43 = vmin.f32 %v316_v35, 1.0  ;;  %v329_v44 = vmin.f32 %v317_v36, 1.0  ;;  %v330_v45 = vmin.f32 %v318_v37, 1.0  ;;  %v331_v46 = vmin.f32 %v319_v38, 1.0 }
  0x7f   : > { %336 = vst [vmem:[%s1439_s9] sm:$0xff] %v324_v39  ;;  %337 = vst [vmem:[%s1439_s9 + $0x8] sm:$0xff] %v325_v40  ;;  %v308_v47 = vadd.f32 %v299_v19, %v293_v15  ;;  %v309_v48 = vadd.f32 %v299_v19, %v294_v20  ;;  %v310_v49 = vadd.f32 %v299_v19, %v295_v21 }
  0x80   : > { %338 = vst [vmem:[%s1439_s9 + $0x10] sm:$0xff] %v326_v41  ;;  %339 = vst [vmem:[%s1439_s9 + $0x18] sm:$0xff] %v327_v42  ;;  %v311_v50 = vadd.f32 %v299_v19, %v296_v22 }
  0x81   : > { %340 = vst [vmem:[%s1439_s9 + $0x20] sm:$0xff] %v328_v43  ;;  %341 = vst [vmem:[%s1439_s9 + $0x28] sm:$0xff] %v329_v44  ;;  %v320_v51 = vmax.f32 %v308_v47, 0.0  ;;  %v321_v52 = vmax.f32 %v309_v48, 0.0  ;;  %v322_v53 = vmax.f32 %v310_v49, 0.0 }
  0x82   : > { %342 = vst [vmem:[%s1439_s9 + $0x30] sm:$0xff] %v330_v45  ;;  %343 = vst [vmem:[%s1439_s9 + $0x38] sm:$0xff] %v331_v46  ;;  %v323_v54 = vmax.f32 %v311_v50, 0.0 }
  0x83   : > { %v332_v55 = vmin.f32 %v320_v51, 1.0  ;;  %v333_v56 = vmin.f32 %v321_v52, 1.0  ;;  %v334_v57 = vmin.f32 %v322_v53, 1.0 }
  0x84   : > { %v335_v58 = vmin.f32 %v323_v54, 1.0 }
  0x85   : > { %344 = vst [vmem:[%s1439_s9 + $0x40] sm:$0xff] %v332_v55  ;;  %345 = vst [vmem:[%s1439_s9 + $0x48] sm:$0xff] %v333_v56 }
  0x86   : > { %346 = vst [vmem:[%s1439_s9 + $0x50] sm:$0xff] %v334_v57  ;;  %347 = vst [vmem:[%s1439_s9 + $0x58] sm:$0xff] %v335_v58 }
  0x87 PF: > { %p348_p7 = scmp.gt.f32.partialorder %s1429_s5, 0.5 }
  0x88   : > { %v352_v59 = vld [vmem:[%s1439_s9] sm:$0xff] (%p348_p7)  ;;  %v384_v62 = vstv (%p348_p7), %s1421_s22  ;;  %s397_s16 = ssub.f32 (%p348_p7), 1.0, %s1421_s22  ;;  %v353_v4 = vld [vmem:[%s1439_s9 + $0x8] sm:$0xff] (%p348_p7)  ;;  %v354_v12 = vld [vmem:[%s1439_s9 + $0x10] sm:$0xff] (%p348_p7) }
  0x89   : > { %351 = sbr.rel (!%p348_p7) target bundleno = 160 (0xa0), region = 44  ;;  %v356_v60 = vld [vmem:[%s1439_s9 + $0x20] sm:$0xff] (%p348_p7)  ;;  %v364_v63 = vmul.f32 (%p348_p7), 0.2989, %v352_v59  ;;  %v385_v2 = vmul.f32 (%p348_p7), %v384_v62, %v352_v59  ;;  %v357_v5 = vld [vmem:[%s1439_s9 + $0x28] sm:$0xff] (%p348_p7)  ;;  %v386_v11 = vmul.f32 (%p348_p7), %v384_v62, %v353_v4  ;;  %v358_v13 = vld [vmem:[%s1439_s9 + $0x30] sm:$0xff] (%p348_p7)  ;;  %v387_v25 = vmul.f32 (%p348_p7), %v384_v62, %v354_v12 }
  0x8a   : > { %v368_v0 = vmul.f32 (%p348_p7), 0.587, %v356_v60  ;;  %v398_v3 = vstv (%p348_p7), %s397_s16  ;;  %v365_v8 = vmul.f32 (%p348_p7), 0.2989, %v353_v4  ;;  %v369_v9 = vmul.f32 (%p348_p7), 0.587, %v357_v5 }
  0x8b   : > { %v389_v15 = vmul.f32 (%p348_p7), %v384_v62, %v356_v60  ;;  %v390_v16 = vmul.f32 (%p348_p7), %v384_v62, %v357_v5  ;;  %v366_v20 = vmul.f32 (%p348_p7), 0.2989, %v354_v12  ;;  %v370_v21 = vmul.f32 (%p348_p7), 0.587, %v358_v13  ;;  %v355_v22 = vld [vmem:[%s1439_s9 + $0x18] sm:$0xff] (%p348_p7) }
  0x8c   : > { %v360_v61 = vld [vmem:[%s1439_s9 + $0x40] sm:$0xff] (%p348_p7)  ;;  %v361_v6 = vld [vmem:[%s1439_s9 + $0x48] sm:$0xff] (%p348_p7)  ;;  %v372_v7 = vadd.f32 (%p348_p7), %v368_v0, %v364_v63  ;;  %v373_v19 = vadd.f32 (%p348_p7), %v369_v9, %v365_v8  ;;  %v359_v23 = vld [vmem:[%s1439_s9 + $0x38] sm:$0xff] (%p348_p7)  ;;  %v367_v27 = vmul.f32 (%p348_p7), 0.2989, %v355_v22  ;;  %v388_v34 = vmul.f32 (%p348_p7), %v384_v62, %v355_v22 }
  0x8d   : > { %v376_v1 = vmul.f32 (%p348_p7), 0.114, %v360_v61  ;;  %v377_v10 = vmul.f32 (%p348_p7), 0.114, %v361_v6  ;;  %v362_v14 = vld [vmem:[%s1439_s9 + $0x50] sm:$0xff] (%p348_p7)  ;;  %v393_v17 = vmul.f32 (%p348_p7), %v384_v62, %v360_v61  ;;  %v363_v26 = vld [vmem:[%s1439_s9 + $0x58] sm:$0xff] (%p348_p7)  ;;  %v394_v28 = vmul.f32 (%p348_p7), %v384_v62, %v361_v6 }
  0x8e   : > { %v378_v24 = vmul.f32 (%p348_p7), 0.114, %v362_v14  ;;  %v374_v31 = vadd.f32 (%p348_p7), %v370_v21, %v366_v20  ;;  %v371_v32 = vmul.f32 (%p348_p7), 0.587, %v359_v23  ;;  %v379_v33 = vmul.f32 (%p348_p7), 0.114, %v363_v26 }
  0x8f   : > { %v380_v18 = vadd.f32 (%p348_p7), %v376_v1, %v372_v7  ;;  %v381_v30 = vadd.f32 (%p348_p7), %v377_v10, %v373_v19  ;;  %v391_v35 = vmul.f32 (%p348_p7), %v384_v62, %v358_v13  ;;  %v392_v36 = vmul.f32 (%p348_p7), %v384_v62, %v359_v23 }
  0x90   : > { %v382_v39 = vadd.f32 %v378_v24, %v374_v31  ;;  %v375_v40 = vadd.f32 %v371_v32, %v367_v27  ;;  %v395_v43 = vmul.f32 %v384_v62, %v362_v14  ;;  %v396_v44 = vmul.f32 %v384_v62, %v363_v26 }
  0x91   : > { %v399_v29 = vmul.f32 %v398_v3, %v380_v18  ;;  %v400_v38 = vmul.f32 %v398_v3, %v381_v30 }
  0x92   : > { %v401_v47 = vmul.f32 %v398_v3, %v382_v39  ;;  %v383_v48 = vadd.f32 %v379_v33, %v375_v40 }
  0x93   : > { %v403_v37 = vadd.f32 %v399_v29, %v385_v2  ;;  %v407_v41 = vadd.f32 %v399_v29, %v389_v15  ;;  %v411_v42 = vadd.f32 %v399_v29, %v393_v17  ;;  %v404_v46 = vadd.f32 %v400_v38, %v386_v11 }
  0x94   : > { %v408_v50 = vadd.f32 %v400_v38, %v390_v16  ;;  %v412_v52 = vadd.f32 %v400_v38, %v394_v28  ;;  %v405_v55 = vadd.f32 %v401_v47, %v387_v25  ;;  %v402_v56 = vmul.f32 %v398_v3, %v383_v48 }
  0x95   : > { %v415_v45 = vmax.f32 %v403_v37, 0.0  ;;  %v419_v49 = vmax.f32 %v407_v41, 0.0  ;;  %v423_v51 = vmax.f32 %v411_v42, 0.0  ;;  %v416_v54 = vmax.f32 %v404_v46, 0.0 }
  0x96   : > { %v420_v58 = vmax.f32 %v408_v50, 0.0  ;;  %v409_v59 = vadd.f32 %v401_v47, %v391_v35  ;;  %v417_v62 = vmax.f32 %v405_v55, 0.0  ;;  %v406_v63 = vadd.f32 %v402_v56, %v388_v34 }
  0x97   : > { %v427_v53 = vmin.f32 %v415_v45, 1.0  ;;  %v431_v57 = vmin.f32 %v419_v49, 1.0  ;;  %v435_v60 = vmin.f32 %v423_v51, 1.0  ;;  %v428_v61 = vmin.f32 %v416_v54, 1.0 }
  0x98   : > { %v410_v0 = vadd.f32 %v402_v56, %v392_v36  ;;  %v432_v1 = vmin.f32 %v420_v58, 1.0  ;;  %v421_v2 = vmax.f32 %v409_v59, 0.0  ;;  %v424_v4 = vmax.f32 %v412_v52, 0.0 }
  0x99   : > { %439 = vst [vmem:[%s1439_s9] sm:$0xff] %v427_v53  ;;  %443 = vst [vmem:[%s1439_s9 + $0x20] sm:$0xff] %v431_v57  ;;  %v413_v3 = vadd.f32 %v401_v47, %v395_v43  ;;  %v429_v5 = vmin.f32 %v417_v62, 1.0  ;;  %v418_v6 = vmax.f32 %v406_v63, 0.0  ;;  %v414_v8 = vadd.f32 %v402_v56, %v396_v44 }
  0x9a   : > { %447 = vst [vmem:[%s1439_s9 + $0x40] sm:$0xff] %v435_v60  ;;  %440 = vst [vmem:[%s1439_s9 + $0x8] sm:$0xff] %v428_v61  ;;  %v422_v7 = vmax.f32 %v410_v0, 0.0  ;;  %v433_v9 = vmin.f32 %v421_v2, 1.0  ;;  %v436_v10 = vmin.f32 %v424_v4, 1.0 }
  0x9b   : > { %444 = vst [vmem:[%s1439_s9 + $0x28] sm:$0xff] %v432_v1  ;;  %v425_v11 = vmax.f32 %v413_v3, 0.0  ;;  %441 = vst [vmem:[%s1439_s9 + $0x10] sm:$0xff] %v429_v5  ;;  %v430_v12 = vmin.f32 %v418_v6, 1.0  ;;  %v426_v14 = vmax.f32 %v414_v8, 0.0 }
  0x9c   : > { %v434_v13 = vmin.f32 %v422_v7, 1.0  ;;  %445 = vst [vmem:[%s1439_s9 + $0x30] sm:$0xff] %v433_v9  ;;  %448 = vst [vmem:[%s1439_s9 + $0x48] sm:$0xff] %v436_v10 }
  0x9d   : > { %v437_v15 = vmin.f32 %v425_v11, 1.0  ;;  %442 = vst [vmem:[%s1439_s9 + $0x18] sm:$0xff] %v430_v12  ;;  %v438_v16 = vmin.f32 %v426_v14, 1.0 }
  0x9e   : > { %446 = vst [vmem:[%s1439_s9 + $0x38] sm:$0xff] %v434_v13 }
  0x9f   : > { %449 = vst [vmem:[%s1439_s9 + $0x50] sm:$0xff] %v437_v15  ;;  %450 = vst [vmem:[%s1439_s9 + $0x58] sm:$0xff] %v438_v16 }
  0xa0 PF: > { %p451_p10 = scmp.gt.f32.partialorder %s1431_s7, 0.5 }
  0xa1   : > { %v1550_v17 = vld [vmem:[%s1439_s9] sm:$0xff] (%p451_p10)  ;;  %v1563_v22 = vld [vmem:[%s1439_s9 + $0x8] sm:$0xff] (%p451_p10)  ;;  %s627_s18 = sadd.f32 (%p451_p10), 1.0, %s1423_s23 }
  0xa2   : > { %454 = sbr.rel (!%p451_p10) target bundleno = 253 (0xfd), region = 48  ;;  %v1553_v18 = vld [vmem:[%s1439_s9 + $0x20] sm:$0xff] (%p451_p10)  ;;  %v1566_v23 = vld [vmem:[%s1439_s9 + $0x28] sm:$0xff] (%p451_p10)  ;;  %v1580_v29 = vld [vmem:[%s1439_s9 + $0x10] sm:$0xff] (%p451_p10) }
  0xa3   : > { %v1556_v19 = vld [vmem:[%s1439_s9 + $0x40] sm:$0xff] (%p451_p10)  ;;  %v467_v20 = vmax.f32 (%p451_p10), %v1550_v17, %v1553_v18  ;;  %v475_v21 = vmin.f32 (%p451_p10), %v1550_v17, %v1553_v18  ;;  %v1569_v24 = vld [vmem:[%s1439_s9 + $0x48] sm:$0xff] (%p451_p10)  ;;  %v468_v25 = vmax.f32 (%p451_p10), %v1563_v22, %v1566_v23  ;;  %v476_v26 = vmin.f32 (%p451_p10), %v1563_v22, %v1566_v23  ;;  %v1583_v30 = vld [vmem:[%s1439_s9 + $0x30] sm:$0xff] (%p451_p10) }
  0xa4   : > { %v1590_v33 = vld [vmem:[%s1439_s9 + $0x18] sm:$0xff] (%p451_p10)  ;;  %v469_v37 = vmax.f32 (%p451_p10), %v1580_v29, %v1583_v30  ;;  %v477_v39 = vmin.f32 (%p451_p10), %v1580_v29, %v1583_v30  ;;  %v1638_v56 = vstv (%p451_p10), %s627_s18 }
  0xa5   : > { %v1576_v27 = vmax.f32 (%p451_p10), %v467_v20, %v1556_v19  ;;  %v479_v28 = vmin.f32 (%p451_p10), %v475_v21, %v1556_v19  ;;  %v1586_v31 = vmax.f32 (%p451_p10), %v468_v25, %v1569_v24  ;;  %v480_v32 = vmin.f32 (%p451_p10), %v476_v26, %v1569_v24  ;;  %v1593_v34 = vld [vmem:[%s1439_s9 + $0x38] sm:$0xff] (%p451_p10) }
  0xa6   : > { %v470_v40 = vmax.f32 (%p451_p10), %v1590_v33, %v1593_v34  ;;  %v1609_v42 = vld [vmem:[%s1439_s9 + $0x50] sm:$0xff] (%p451_p10)  ;;  %v478_v43 = vmin.f32 (%p451_p10), %v1590_v33, %v1593_v34  ;;  %v1615_v45 = vld [vmem:[%s1439_s9 + $0x58] sm:$0xff] (%p451_p10) }
  0xa7   : > { %vm483_vm0 = vcmp.eq.f32.partialorder (%p451_p10), %v1576_v27, %v479_v28  ;;  %v487_v35 = vsub.f32 (%p451_p10), %v1576_v27, %v479_v28  ;;  %vm484_vm1 = vcmp.eq.f32.partialorder (%p451_p10), %v1586_v31, %v480_v32  ;;  %v1606_v41 = vsub.f32 (%p451_p10), %v1586_v31, %v480_v32 }
  0xa8   : > { %v491_v36 = vsel (%p451_p10), %vm483_vm0, 1.0, %v1576_v27  ;;  %v492_v44 = vsel (%p451_p10), %vm484_vm1, 1.0, %v1586_v31  ;;  %v1619_v47 = vmax.f32 (%p451_p10), %v469_v37, %v1609_v42  ;;  %v481_v48 = vmin.f32 (%p451_p10), %v477_v39, %v1609_v42 }
  0xa9   : > { %1100 = vrcp.f32 %v491_v36  ;;  %v515_v38 = vsel %vm483_vm0, 1.0, %v487_v35  ;;  %v516_v46 = vsel %vm484_vm1, 1.0, %v1606_v41  ;;  %v1623_v49 = vmax.f32 %v470_v40, %v1615_v45 }
  0xaa   : > { %1102 = vrcp.f32 %v515_v38  ;;  %v482_v50 = vmin.f32 %v478_v43, %v1615_v45  ;;  %vm485_vm2 = vcmp.eq.f32.partialorder %v1619_v47, %v481_v48  ;;  %v1629_v51 = vsub.f32 %v1619_v47, %v481_v48 }
  0xab   : > { %1104 = vrcp.f32 %v492_v44  ;;  %v493_v52 = vsel %vm485_vm2, 1.0, %v1619_v47  ;;  %v535_v55 = vsub.f32 %v1576_v27, %v1550_v17  ;;  %v543_v60 = vsub.f32 %v1576_v27, %v1553_v18 }
  0xac   : > { %1106 = vrcp.f32 %v516_v46  ;;  %vm486_vm3 = vcmp.eq.f32.partialorder %v1623_v49, %v482_v50  ;;  %v1634_v53 = vsub.f32 %v1623_v49, %v482_v50  ;;  %v1641_v57 = vsel %vm485_vm2, 1.0, %v1629_v51 }
  0xad   : > { %1108 = vrcp.f32 %v493_v52  ;;  %v551_v61 = vsub.f32 %v1576_v27, %v1556_v19  ;;  %vm559_vm4 = vcmp.eq.f32.partialorder %v1576_v27, %v1550_v17  ;;  %vm571_vm5 = vcmp.eq.f32.partialorder %v1576_v27, %v1553_v18 }
  0xae   : > { %v1648_v62 = vsel %vm486_vm3, 1.0, %v1634_v53  ;;  %v1655_v0 = vsel %vm486_vm3, 1.0, %v1623_v49  ;;  %vm575_vm6 = vcmp.ne.f32.partialorder %v1576_v27, %v1550_v17  ;;  %vm595_vm7 = vcmp.ne.f32.partialorder %v1576_v27, %v1553_v18 }
  0xaf   : > { %1110 = vrcp.f32 %v1641_v57  ;;  %v536_v6 = vsub.f32 %v1586_v31, %v1563_v22  ;;  %v544_v9 = vsub.f32 %v1586_v31, %v1566_v23  ;;  %v552_v12 = vsub.f32 %v1586_v31, %v1569_v24  ;;  %vm1689_vm12 = vmand %vm571_vm5, %vm575_vm6 }
  0xb0   : > { %1112 = vrcp.f32 %v1648_v62  ;;  %vm560_vm8 = vcmp.eq.f32.partialorder %v1586_v31, %v1563_v22  ;;  %vm572_vm9 = vcmp.eq.f32.partialorder %v1586_v31, %v1566_v23  ;;  %vm576_vm10 = vcmp.ne.f32.partialorder %v1586_v31, %v1563_v22  ;;  %vm1699_vm13 = vmand %vm595_vm7, %vm575_vm6 }
  0xb1   : > { %1114 = vrcp.f32 %v1655_v0  ;;  %vm596_vm11 = vcmp.ne.f32.partialorder %v1586_v31, %v1566_v23  ;;  %v537_v26 = vsub.f32 %v1619_v47, %v1580_v29  ;;  %vm1724_vm14 = vmand %vm572_vm9, %vm576_vm10  ;;  %vm573_vm15 = vcmp.eq.f32.partialorder %v1619_v47, %v1583_v30 }
  0xb2   : > { %vm577_vm0 = vcmp.ne.f32.partialorder %v1619_v47, %v1580_v29  ;;  %vm600_vm1 = vmand %vm596_vm11, %vm576_vm10  ;;  %vm597_vm2 = vcmp.ne.f32.partialorder %v1619_v47, %v1583_v30  ;;  %vm561_vm3 = vcmp.eq.f32.partialorder %v1619_v47, %v1580_v29  ;;  %v546_v22 = vsub.f32 %v1623_v49, %v1593_v34 }
  0xb3   : > { %v1101_v54 = vpop.eup %1100  ;;  %vm578_vm5 = vcmp.ne.f32.partialorder %v1623_v49, %v1590_v33  ;;  %vm562_vm6 = vcmp.eq.f32.partialorder %v1623_v49, %v1590_v33  ;;  %vm598_vm7 = vcmp.ne.f32.partialorder %v1623_v49, %v1593_v34  ;;  %vm601_vm9 = vmand %vm597_vm2, %vm577_vm0 }
  0xb4   : > { %v1103_v58 = vpop.eup %1102  ;;  %v499_v59 = vmul.f32 %v1101_v54, %v491_v36 }
  0xb5   : > { %v523_v63 = vmul.f32 %v1103_v58, %v515_v38  ;;  %v1105_v1 = vpop.eup %1104 }
  0xb6   : > { %v503_v2 = vsub.f32 2.0, %v499_v59  ;;  %v1107_v4 = vpop.eup %1106  ;;  %v500_v5 = vmul.f32 %v1105_v1, %v492_v44  ;;  %v545_v44 = vsub.f32 %v1619_v47, %v1583_v30 }
  0xb7   : > { %v527_v3 = vsub.f32 2.0, %v523_v63  ;;  %v524_v8 = vmul.f32 %v1107_v4, %v516_v46  ;;  %v1109_v15 = vpop.eup %1108 }
  0xb8   : > { %v507_v7 = vmul.f32 %v1101_v54, %v503_v2  ;;  %v504_v11 = vsub.f32 2.0, %v500_v5  ;;  %v501_v37 = vmul.f32 %v1109_v15, %v493_v52  ;;  %v553_v52 = vsub.f32 %v1619_v47, %v1609_v42 }
  0xb9   : > { %v531_v10 = vmul.f32 %v1103_v58, %v527_v3  ;;  %v528_v14 = vsub.f32 2.0, %v524_v8  ;;  %v1111_v18 = vpop.eup %1110  ;;  %v538_v5 = vsub.f32 %v1623_v49, %v1590_v33 }
  0xba   : > { %v1672_v13 = vmul.f32 %v507_v7, %v487_v35  ;;  %v508_v24 = vmul.f32 %v1105_v1, %v504_v11  ;;  %v505_v1 = vsub.f32 2.0, %v501_v37  ;;  %v525_v8 = vmul.f32 %v1111_v18, %v1641_v57 }
  0xbb   : > { %v539_v16 = vmul.f32 %v535_v55, %v531_v10  ;;  %v547_v19 = vmul.f32 %v543_v60, %v531_v10  ;;  %v555_v20 = vmul.f32 %v551_v61, %v531_v10  ;;  %v532_v25 = vmul.f32 %v1107_v4, %v528_v14  ;;  %v1113_v60 = vpop.eup %1112 }
  0xbc   : > { %v665_v21 = vsub.f32 1.0, %v1672_v13  ;;  %v1716_v17 = vmul.f32 %v508_v24, %v1606_v41  ;;  %v1115_v2 = vpop.eup %1114  ;;  %v526_v11 = vmul.f32 %v1113_v60, %v1648_v62  ;;  %v529_v57 = vsub.f32 2.0, %v525_v8 }
  0xbd   : > { %v563_v28 = vsub.f32 %v555_v20, %v547_v19  ;;  %v583_v35 = vadd.f32 2.0, %v539_v16  ;;  %v603_v36 = vadd.f32 4.0, %v547_v19  ;;  %v540_v39 = vmul.f32 %v536_v6, %v532_v25 }
  0xbe   : > { %v548_v40 = vmul.f32 %v544_v9, %v532_v25  ;;  %v556_v43 = vmul.f32 %v552_v12, %v532_v25  ;;  %v669_v54 = vmul.f32 %v665_v21, %v1576_v27  ;;  %v666_v7 = vsub.f32 1.0, %v1716_v17 }
  0xbf   : > { %v567_v46 = vsel %vm559_vm4, %v563_v28, 0.0  ;;  %v587_v48 = vsub.f32 %v583_v35, %v555_v20  ;;  %v607_v50 = vsub.f32 %v603_v36, %v539_v16  ;;  %v584_v58 = vadd.f32 2.0, %v540_v39 }
  0xc0   : > { %v564_v55 = vsub.f32 %v556_v43, %v548_v40  ;;  %v604_v59 = vadd.f32 4.0, %v548_v40  ;;  %v673_v23 = vmax.f32 %v669_v54, 0.0  ;;  %v509_v16 = vmul.f32 %v1109_v15, %v505_v1 }
  0xc1   : > { %v591_v61 = vsel %vm1689_vm12, %v587_v48, 0.0  ;;  %v611_v63 = vsel %vm1699_vm13, %v607_v50, 0.0  ;;  %v588_v3 = vsub.f32 %v584_v58, %v556_v43  ;;  %v502_v19 = vmul.f32 %v1115_v2, %v1655_v0  ;;  %vm602_vm12 = vmand %vm598_vm7, %vm578_vm5 }
  0xc2   : > { %v615_v41 = vadd.f32 %v591_v61, %v567_v46  ;;  %v568_v4 = vsel %vm560_vm8, %v564_v55, 0.0  ;;  %v608_v6 = vsub.f32 %v604_v59, %v540_v39  ;;  %v530_v21 = vsub.f32 2.0, %v526_v11  ;;  %vm1783_vm8 = vmand %vm573_vm15, %vm577_vm0 }
  0xc3   : > { %v592_v10 = vsel %vm1724_vm14, %v588_v3, 0.0  ;;  %v554_v24 = vsub.f32 %v1623_v49, %v1615_v45  ;;  %v670_v28 = vmul.f32 %v666_v7, %v1586_v31  ;;  %vm574_vm4 = vcmp.eq.f32.partialorder %v1623_v49, %v1593_v34 }
  0xc4   : > { %v619_v9 = vadd.f32 %v615_v41, %v611_v63  ;;  %v612_v12 = vsel %vm600_vm1, %v608_v6, 0.0  ;;  %v616_v14 = vadd.f32 %v592_v10, %v568_v4  ;;  %v533_v15 = vmul.f32 %v1111_v18, %v529_v57  ;;  %vm582_vm10 = vmand %vm574_vm4, %vm578_vm5 }
  0xc5   : > { %v534_v32 = vmul.f32 %v1113_v60, %v530_v21  ;;  %v1767_v45 = vmin.f32 %v673_v23, 1.0  ;;  %v1770_v35 = vmul.f32 %v509_v16, %v1629_v51  ;;  %v506_v36 = vsub.f32 2.0, %v502_v19 }
  0xc6   : > { %v623_v20 = vmul.f32 0.16666667, %v619_v9  ;;  %v620_v25 = vadd.f32 %v616_v14, %v612_v12  ;;  %v541_v38 = vmul.f32 %v537_v26, %v533_v15  ;;  %v549_v39 = vmul.f32 %v545_v44, %v533_v15 }
  0xc7   : > { %v557_v40 = vmul.f32 %v553_v52, %v533_v15  ;;  %v674_v46 = vmax.f32 %v670_v28, 0.0  ;;  %v667_v48 = vsub.f32 1.0, %v1770_v35  ;;  %v542_v50 = vmul.f32 %v538_v5, %v534_v32 }
  0xc8   : > { %v629_v62 = vadd.f32 %v1638_v56, %v623_v20  ;;  %v624_v0 = vmul.f32 0.16666667, %v620_v25  ;;  %v585_v26 = vadd.f32 2.0, %v541_v38  ;;  %v605_v44 = vadd.f32 4.0, %v549_v39 }
  0xc9   : > { %v565_v54 = vsub.f32 %v557_v40, %v549_v39  ;;  %v510_v55 = vmul.f32 %v1115_v2, %v506_v36  ;;  %v550_v58 = vmul.f32 %v546_v22, %v534_v32  ;;  %v558_v59 = vmul.f32 %v554_v24, %v534_v32 }
  0xca   : > { %v633_v37 = vfloor.f32 %v629_v62  ;;  %v630_v43 = vadd.f32 %v1638_v56, %v624_v0  ;;  %v589_v63 = vsub.f32 %v585_v26, %v557_v40  ;;  %v609_v42 = vsub.f32 %v605_v44, %v541_v38 }
  0xcb   : > { %v569_v61 = vsel %vm561_vm3, %v565_v54, 0.0  ;;  %v566_v41 = vsub.f32 %v558_v59, %v550_v58  ;;  %v586_v4 = vadd.f32 2.0, %v542_v50  ;;  %v606_v3 = vadd.f32 4.0, %v550_v58 }
  0xcc   : > { %v637_v18 = vsub.f32 %v629_v62, %v633_v37  ;;  %v634_v52 = vfloor.f32 %v630_v43  ;;  %v1796_v6 = vmin.f32 %v674_v46, 1.0  ;;  %v593_v30 = vsel %vm1783_vm8, %v589_v63, 0.0 }
  0xcd   : > { %v613_v2 = vsel %vm601_vm9, %v609_v42, 0.0  ;;  %v617_v8 = vadd.f32 %v593_v30, %v569_v61  ;;  %v1801_v22 = vmul.f32 %v667_v48, %v1619_v47  ;;  %v590_v29 = vsub.f32 %v586_v4, %v558_v59 }
  0xce   : > { %v641_v60 = vmul.f32 6.0, %v637_v18  ;;  %v638_v1 = vsub.f32 %v630_v43, %v634_v52  ;;  %v610_v10 = vsub.f32 %v606_v3, %v542_v50  ;;  %v1816_v14 = vmul.f32 %v510_v55, %v1634_v53 }
  0xcf   : > { %v621_v12 = vadd.f32 %v617_v8, %v613_v2  ;;  %v570_v16 = vsel %vm562_vm6, %v566_v41, 0.0  ;;  %v594_v21 = vsel %vm582_vm10, %v590_v29, 0.0 }
  0xd0   : > { %v645_v5 = vfloor.f32 %v641_v60  ;;  %v642_v7 = vmul.f32 6.0, %v638_v1  ;;  %v614_v34 = vsel %vm602_vm12, %v610_v10, 0.0  ;;  %v668_v24 = vsub.f32 1.0, %v1816_v14 }
  0xd1   : > { %v625_v62 = vmul.f32 0.16666667, %v621_v12  ;;  %v618_v15 = vadd.f32 %v594_v21, %v570_v16 }
  0xd2   : > { %v649_v9 = vsub.f32 %v641_v60, %v645_v5  ;;  %vm653_vm11 = vcmp.ge.f32.partialorder %v645_v5, 6.0  ;;  %v1013_v23 = vadd.f32 -6.0, %v645_v5  ;;  %v646_v11 = vfloor.f32 %v642_v7 }
  0xd3   : > { %v631_v39 = vadd.f32 %v1638_v56, %v625_v62 }
  0xd4   : > { %v1821_v19 = vsel %vm653_vm11, %v1013_v23, %v645_v5  ;;  %v681_v20 = vmul.f32 %v649_v9, %v1672_v13  ;;  %v701_v57 = vsub.f32 1.0, %v649_v9  ;;  %v650_v28 = vsub.f32 %v642_v7, %v646_v11 }
  0xd5   : > { %vm725_vm13 = vcmp.eq.f32.partialorder %v1821_v19, 1.0  ;;  %vm733_vm14 = vcmp.eq.f32.partialorder %v1821_v19, 2.0  ;;  %vm654_vm15 = vcmp.ge.f32.partialorder %v646_v11, 6.0  ;;  %vm741_vm0 = vcmp.eq.f32.partialorder %v1821_v19, 3.0 }
  0xd6   : > { %v685_v25 = vsub.f32 1.0, %v681_v20  ;;  %v705_v53 = vmul.f32 %v701_v57, %v1672_v13  ;;  %v1014_v33 = vadd.f32 -6.0, %v646_v11  ;;  %v682_v36 = vmul.f32 %v650_v28, %v1716_v17 }
  0xd7   : > { %v702_v37 = vsub.f32 1.0, %v650_v28  ;;  %vm749_vm1 = vcmp.eq.f32.partialorder %v1821_v19, 4.0  ;;  %v622_v13 = vadd.f32 %v618_v15, %v614_v34  ;;  %v635_v26 = vfloor.f32 %v631_v39 }
  0xd8   : > { %v689_v32 = vmul.f32 %v685_v25, %v1576_v27  ;;  %v709_v0 = vsub.f32 1.0, %v705_v53  ;;  %v1832_v38 = vsel %vm654_vm15, %v1014_v33, %v646_v11  ;;  %v686_v46 = vsub.f32 1.0, %v682_v36 }
  0xd9   : > { %v706_v48 = vmul.f32 %v702_v37, %v1716_v17  ;;  %vm726_vm2 = vcmp.eq.f32.partialorder %v1832_v38, 1.0  ;;  %vm734_vm3 = vcmp.eq.f32.partialorder %v1832_v38, 2.0  ;;  %vm742_vm4 = vcmp.eq.f32.partialorder %v1832_v38, 3.0 }
  0xda   : > { %v693_v40 = vmax.f32 %v689_v32, 0.0  ;;  %v713_v43 = vmul.f32 %v709_v0, %v1576_v27  ;;  %vm750_vm5 = vcmp.eq.f32.partialorder %v1832_v38, 4.0  ;;  %v690_v54 = vmul.f32 %v686_v46, %v1586_v31 }
  0xdb   : > { %v710_v51 = vsub.f32 1.0, %v706_v48  ;;  %v626_v44 = vmul.f32 0.16666667, %v622_v13  ;;  %vm757_vm6 = vcmp.eq.f32.partialorder %v1821_v19, 0.0  ;;  %vm758_vm7 = vcmp.eq.f32.partialorder %v1832_v38, 0.0 }
  0xdc   : > { %v697_v50 = vmin.f32 %v693_v40, 1.0  ;;  %v717_v18 = vmax.f32 %v713_v43, 0.0  ;;  %v694_v55 = vmax.f32 %v690_v54, 0.0  ;;  %v639_v60 = vsub.f32 %v631_v39, %v635_v26 }
  0xdd   : > { %v714_v58 = vmul.f32 %v710_v51, %v1586_v31  ;;  %v632_v61 = vadd.f32 %v1638_v56, %v626_v44  ;;  %v675_v53 = vmax.f32 %v1801_v22, 0.0  ;;  %v672_v36 = vmul.f32 %v668_v24, %v1623_v49 }
  0xde   : > { %v721_v17 = vmin.f32 %v717_v18, 1.0  ;;  %v729_v52 = vsel %vm725_vm13, %v697_v50, %v1576_v27  ;;  %v781_v63 = vsel %vm757_vm6, %v1767_v45, %v697_v50  ;;  %v698_v1 = vmin.f32 %v694_v55, 1.0 }
  0xdf   : > { %v737_v59 = vsel %vm733_vm14, %v1767_v45, %v729_v52  ;;  %v718_v41 = vmax.f32 %v714_v58, 0.0  ;;  %v643_v5 = vmul.f32 6.0, %v639_v60  ;;  %v636_v30 = vfloor.f32 %v632_v61 }
  0xe0   : > { %v745_v42 = vsel %vm741_vm0, %v1767_v45, %v737_v59  ;;  %v761_v4 = vsel %vm757_vm6, %v721_v17, %v1767_v45  ;;  %v730_v7 = vsel %vm726_vm2, %v698_v1, %v1586_v31  ;;  %v785_v29 = vsel %vm725_vm13, %v1767_v45, %v781_v63 }
  0xe1   : > { %v753_v3 = vsel %vm749_vm1, %v721_v17, %v745_v42  ;;  %v765_v2 = vsel %vm725_vm13, %v1576_v27, %v761_v4  ;;  %v722_v56 = vmin.f32 %v718_v41, 1.0  ;;  %v738_v9 = vsel %vm734_vm3, %v1796_v6, %v730_v7 }
  0xe2   : > { %801 = vst [vmem:[%s1439_s9] sm:$0xff] %v753_v3  ;;  %v769_v8 = vsel %vm733_vm14, %v1576_v27, %v765_v2  ;;  %v647_v23 = vfloor.f32 %v643_v5  ;;  %v640_v10 = vsub.f32 %v632_v61, %v636_v30  ;;  %v746_v12 = vsel %vm742_vm4, %v1796_v6, %v738_v9 }
  0xe3   : > { %v773_v11 = vsel %vm741_vm0, %v697_v50, %v769_v8  ;;  %v762_v20 = vsel %vm758_vm7, %v722_v56, %v1796_v6  ;;  %v789_v57 = vsel %vm733_vm14, %v721_v17, %v785_v29  ;;  %v754_v21 = vsel %vm750_vm5, %v722_v56, %v746_v12 }
  0xe4   : > { %v777_v16 = vsel %vm749_vm1, %v1767_v45, %v773_v11  ;;  %v651_v34 = vsub.f32 %v643_v5, %v647_v23  ;;  %vm655_vm8 = vcmp.ge.f32.partialorder %v647_v23, 6.0  ;;  %v1015_v25 = vadd.f32 -6.0, %v647_v23  ;;  %802 = vst [vmem:[%s1439_s9 + $0x8] sm:$0xff] %v754_v21 }
  0xe5   : > { %1017 = vst [vmem:[%s1439_s9 + $0x20] sm:$0xff] %v777_v16  ;;  %v644_v28 = vmul.f32 6.0, %v640_v10  ;;  %v766_v45 = vsel %vm726_vm2, %v1586_v31, %v762_v20  ;;  %v793_v33 = vsel %vm741_vm0, %v1576_v27, %v789_v57  ;;  %v782_v22 = vsel %vm758_vm7, %v1796_v6, %v698_v1 }
  0xe6   : > { %v683_v62 = vmul.f32 %v651_v34, %v1770_v35  ;;  %v703_v15 = vsub.f32 1.0, %v651_v34  ;;  %v770_v32 = vsel %vm734_vm3, %v1586_v31, %v766_v45  ;;  %v1906_v0 = vsel %vm655_vm8, %v1015_v25, %v647_v23 }
  0xe7   : > { %v648_v13 = vfloor.f32 %v644_v28  ;;  %v774_v40 = vsel %vm742_vm4, %v698_v1, %v770_v32  ;;  %v679_v43 = vmin.f32 %v675_v53, 1.0  ;;  %v797_v48 = vsel %vm749_vm1, %v1576_v27, %v793_v33 }
  0xe8   : > { %v687_v37 = vsub.f32 1.0, %v683_v62  ;;  %v707_v39 = vmul.f32 %v703_v15, %v1770_v35  ;;  %v778_v46 = vsel %vm750_vm5, %v1796_v6, %v774_v40  ;;  %v786_v24 = vsel %vm726_vm2, %v1796_v6, %v782_v22  ;;  %1021 = vst [vmem:[%s1439_s9 + $0x40] sm:$0xff] %v797_v48 }
  0xe9   : > { %v652_v18 = vsub.f32 %v644_v28, %v648_v13  ;;  %vm656_vm9 = vcmp.ge.f32.partialorder %v648_v13, 6.0  ;;  %1018 = vst [vmem:[%s1439_s9 + $0x28] sm:$0xff] %v778_v46  ;;  %vm727_vm10 = vcmp.eq.f32.partialorder %v1906_v0, 1.0  ;;  %v1016_v54 = vadd.f32 -6.0, %v648_v13 }
  0xea   : > { %v691_v50 = vmul.f32 %v687_v37, %v1619_v47  ;;  %v711_v35 = vsub.f32 1.0, %v707_v39  ;;  %v676_v51 = vmax.f32 %v672_v36, 0.0  ;;  %v790_v26 = vsel %vm734_vm3, %v722_v56, %v786_v24 }
  0xeb   : > { %v684_v44 = vmul.f32 %v652_v18, %v1816_v14  ;;  %v704_v6 = vsub.f32 1.0, %v652_v18  ;;  %vm735_vm11 = vcmp.eq.f32.partialorder %v1906_v0, 2.0  ;;  %v664_v17 = vsel %vm656_vm9, %v1016_v54, %v648_v13 }
  0xec   : > { %v695_v19 = vmax.f32 %v691_v50, 0.0  ;;  %v715_v27 = vmul.f32 %v711_v35, %v1619_v47  ;;  %vm759_vm12 = vcmp.eq.f32.partialorder %v1906_v0, 0.0  ;;  %v794_v52 = vsel %vm742_vm4, %v1586_v31, %v790_v26 }
  0xed   : > { %v688_v59 = vsub.f32 1.0, %v684_v44  ;;  %v708_v60 = vmul.f32 %v704_v6, %v1816_v14  ;;  %vm743_vm13 = vcmp.eq.f32.partialorder %v1906_v0, 3.0  ;;  %vm751_vm14 = vcmp.eq.f32.partialorder %v1906_v0, 4.0 }
  0xee   : > { %v699_v55 = vmin.f32 %v695_v19, 1.0  ;;  %v719_v58 = vmax.f32 %v715_v27, 0.0  ;;  %v680_v61 = vmin.f32 %v676_v51, 1.0  ;;  %vm728_vm15 = vcmp.eq.f32.partialorder %v664_v17, 1.0 }
  0xef   : > { %v692_v1 = vmul.f32 %v688_v59, %v1623_v49  ;;  %v712_v41 = vsub.f32 1.0, %v708_v60  ;;  %vm736_vm0 = vcmp.eq.f32.partialorder %v664_v17, 2.0  ;;  %v798_v14 = vsel %vm750_vm5, %v1586_v31, %v794_v52 }
  0xf0   : > { %v723_v63 = vmin.f32 %v719_v58, 1.0  ;;  %v731_v42 = vsel %vm727_vm10, %v699_v55, %v1619_v47  ;;  %v783_v3 = vsel %vm759_vm12, %v679_v43, %v699_v55  ;;  %1022 = vst [vmem:[%s1439_s9 + $0x48] sm:$0xff] %v798_v14  ;;  %vm760_vm1 = vcmp.eq.f32.partialorder %v664_v17, 0.0 }
  0xf1   : > { %v739_v4 = vsel %vm735_vm11, %v679_v43, %v731_v42  ;;  %v696_v30 = vmax.f32 %v692_v1, 0.0  ;;  %v716_v2 = vmul.f32 %v712_v41, %v1623_v49  ;;  %v787_v38 = vsel %vm727_vm10, %v679_v43, %v783_v3 }
  0xf2   : > { %v747_v5 = vsel %vm743_vm13, %v679_v43, %v739_v4  ;;  %v763_v56 = vsel %vm759_vm12, %v723_v63, %v679_v43  ;;  %v791_v23 = vsel %vm735_vm11, %v723_v63, %v787_v38  ;;  %vm744_vm2 = vcmp.eq.f32.partialorder %v664_v17, 3.0 }
  0xf3   : > { %v755_v7 = vsel %vm751_vm14, %v723_v63, %v747_v5  ;;  %v767_v31 = vsel %vm727_vm10, %v1619_v47, %v763_v56  ;;  %v700_v8 = vmin.f32 %v696_v30, 1.0  ;;  %v720_v29 = vmax.f32 %v716_v2, 0.0 }
  0xf4   : > { %803 = vst [vmem:[%s1439_s9 + $0x10] sm:$0xff] %v755_v7  ;;  %v771_v9 = vsel %vm735_vm11, %v1619_v47, %v767_v31  ;;  %vm752_vm3 = vcmp.eq.f32.partialorder %v664_v17, 4.0  ;;  %v795_v11 = vsel %vm743_vm13, %v1619_v47, %v791_v23 }
  0xf5   : > { %v775_v10 = vsel %vm743_vm13, %v699_v55, %v771_v9  ;;  %v724_v12 = vmin.f32 %v720_v29, 1.0  ;;  %v732_v16 = vsel %vm728_vm15, %v700_v8, %v1623_v49  ;;  %v799_v57 = vsel %vm751_vm14, %v1619_v47, %v795_v11 }
  0xf6   : > { %v779_v20 = vsel %vm751_vm14, %v679_v43, %v775_v10  ;;  %v740_v21 = vsel %vm736_vm0, %v680_v61, %v732_v16  ;;  %1023 = vst [vmem:[%s1439_s9 + $0x50] sm:$0xff] %v799_v57  ;;  %v784_v34 = vsel %vm760_vm1, %v680_v61, %v700_v8 }
  0xf7   : > { %1019 = vst [vmem:[%s1439_s9 + $0x30] sm:$0xff] %v779_v20  ;;  %v748_v25 = vsel %vm744_vm2, %v680_v61, %v740_v21  ;;  %v764_v53 = vsel %vm760_vm1, %v724_v12, %v680_v61  ;;  %v788_v28 = vsel %vm728_vm15, %v680_v61, %v784_v34 }
  0xf8   : > { %v756_v45 = vsel %vm752_vm3, %v724_v12, %v748_v25  ;;  %v768_v33 = vsel %vm728_vm15, %v1623_v49, %v764_v53  ;;  %v792_v47 = vsel %vm736_vm0, %v724_v12, %v788_v28 }
  0xf9   : > { %804 = vst [vmem:[%s1439_s9 + $0x18] sm:$0xff] %v756_v45  ;;  %v772_v62 = vsel %vm736_vm0, %v1623_v49, %v768_v33  ;;  %v796_v15 = vsel %vm744_vm2, %v1623_v49, %v792_v47 }
  0xfa   : > { %v776_v32 = vsel %vm744_vm2, %v700_v8, %v772_v62  ;;  %v800_v22 = vsel %vm752_vm3, %v1623_v49, %v796_v15 }
  0xfb   : > { %v780_v0 = vsel %vm752_vm3, %v680_v61, %v776_v32  ;;  %1024 = vst [vmem:[%s1439_s9 + $0x58] sm:$0xff] %v800_v22 }
  0xfc   : > { %1020 = vst [vmem:[%s1439_s9 + $0x38] sm:$0xff] %v780_v0 }
  0xfd PF: > { %p815_p12 = scmp.le.f32.partialorder %s1433_s8, 0.5 }
  0xff   : > { %p816_p0 = pnand %p815_p12, %p267_p8 }
 0x100   : > { %v820_v49 = vld [vmem:[%s1439_s9] sm:$0xff] (!%p816_p0)  ;;  %v832_v36 = vstv (!%p816_p0), %s1419_s20  ;;  %s845_s21 = ssub.f32 (!%p816_p0), 1.0, %s1419_s20  ;;  %v821_v37 = vld [vmem:[%s1439_s9 + $0x8] sm:$0xff] (!%p816_p0)  ;;  %v822_v39 = vld [vmem:[%s1439_s9 + $0x10] sm:$0xff] (!%p816_p0) }
 0x101   : > { %819 = sbr.rel (%p816_p0) target bundleno = 275 (0x113), region = 52  ;;  %v833_v13 = vmul.f32 (!%p816_p0), %v832_v36, %v820_v49  ;;  %v834_v40 = vmul.f32 (!%p816_p0), %v832_v36, %v821_v37  ;;  %v835_v43 = vmul.f32 (!%p816_p0), %v832_v36, %v822_v39  ;;  %v823_v46 = vld [vmem:[%s1439_s9 + $0x18] sm:$0xff] (!%p816_p0)  ;;  %v824_v48 = vld [vmem:[%s1439_s9 + $0x20] sm:$0xff] (!%p816_p0)  ;;  %v825_v24 = vld [vmem:[%s1439_s9 + $0x28] sm:$0xff] (!%p816_p0) }
 0x102   : > { %s846_s24 = smul.f32 (!%p816_p0), %s845_s21, %s1436_s10  ;;  %v836_v50 = vmul.f32 (!%p816_p0), %v832_v36, %v823_v46  ;;  %v837_v35 = vmul.f32 (!%p816_p0), %v832_v36, %v824_v48  ;;  %v838_v18 = vmul.f32 (!%p816_p0), %v832_v36, %v825_v24  ;;  %v826_v54 = vld [vmem:[%s1439_s9 + $0x30] sm:$0xff] (!%p816_p0)  ;;  %v828_v26 = vld [vmem:[%s1439_s9 + $0x40] sm:$0xff] (!%p816_p0)  ;;  %v829_v6 = vld [vmem:[%s1439_s9 + $0x48] sm:$0xff] (!%p816_p0) }
 0x103   : > { %v827_v51 = vld [vmem:[%s1439_s9 + $0x38] sm:$0xff] (!%p816_p0)  ;;  %v839_v19 = vmul.f32 (!%p816_p0), %v832_v36, %v826_v54  ;;  %v841_v44 = vmul.f32 (!%p816_p0), %v832_v36, %v828_v26  ;;  %v830_v17 = vld [vmem:[%s1439_s9 + $0x50] sm:$0xff] (!%p816_p0)  ;;  %v842_v58 = vmul.f32 (!%p816_p0), %v832_v36, %v829_v6 }
 0x104   : > { %v840_v27 = vmul.f32 (!%p816_p0), %v832_v36, %v827_v51  ;;  %v831_v52 = vld [vmem:[%s1439_s9 + $0x58] sm:$0xff] (!%p816_p0)  ;;  %v847_v55 = vstv (!%p816_p0), %s846_s24  ;;  %v843_v59 = vmul.f32 (!%p816_p0), %v832_v36, %v830_v17 }
 0x105   : > { %v844_v60 = vmul.f32 (!%p816_p0), %v832_v36, %v831_v52  ;;  %v848_v61 = vadd.f32 (!%p816_p0), %v847_v55, %v833_v13  ;;  %v849_v63 = vadd.f32 (!%p816_p0), %v847_v55, %v834_v40  ;;  %v850_v42 = vadd.f32 (!%p816_p0), %v847_v55, %v835_v43 }
 0x106   : > { %v851_v1 = vadd.f32 (!%p816_p0), %v847_v55, %v836_v50  ;;  %v852_v41 = vadd.f32 (!%p816_p0), %v847_v55, %v837_v35  ;;  %v853_v4 = vadd.f32 (!%p816_p0), %v847_v55, %v838_v18  ;;  %v854_v14 = vadd.f32 (!%p816_p0), %v847_v55, %v839_v19 }
 0x107   : > { %v855_v3 = vadd.f32 (!%p816_p0), %v847_v55, %v840_v27  ;;  %v860_v5 = vmax.f32 (!%p816_p0), %v848_v61, 0.0  ;;  %v861_v30 = vmax.f32 (!%p816_p0), %v849_v63, 0.0  ;;  %v862_v2 = vmax.f32 (!%p816_p0), %v850_v42, 0.0 }
 0x108   : > { %v863_v56 = vmax.f32 %v851_v1, 0.0  ;;  %v864_v7 = vmax.f32 %v852_v41, 0.0  ;;  %v865_v31 = vmax.f32 %v853_v4, 0.0  ;;  %v866_v38 = vmax.f32 %v854_v14, 0.0 }
 0x109   : > { %v867_v8 = vmax.f32 %v855_v3, 0.0  ;;  %v872_v29 = vmin.f32 %v860_v5, 1.0  ;;  %v873_v9 = vmin.f32 %v861_v30, 1.0  ;;  %v874_v23 = vmin.f32 %v862_v2, 1.0 }
 0x10a   : > { %v875_v10 = vmin.f32 %v863_v56, 1.0  ;;  %v876_v11 = vmin.f32 %v864_v7, 1.0  ;;  %v877_v12 = vmin.f32 %v865_v31, 1.0  ;;  %v878_v16 = vmin.f32 %v866_v38, 1.0 }
 0x10b   : > { %v879_v20 = vmin.f32 %v867_v8, 1.0  ;;  %884 = vst [vmem:[%s1439_s9] sm:$0xff] %v872_v29  ;;  %885 = vst [vmem:[%s1439_s9 + $0x8] sm:$0xff] %v873_v9  ;;  %v856_v57 = vadd.f32 %v847_v55, %v841_v44  ;;  %v857_v21 = vadd.f32 %v847_v55, %v842_v58  ;;  %v858_v34 = vadd.f32 %v847_v55, %v843_v59 }
 0x10c   : > { %886 = vst [vmem:[%s1439_s9 + $0x10] sm:$0xff] %v874_v23  ;;  %887 = vst [vmem:[%s1439_s9 + $0x18] sm:$0xff] %v875_v10  ;;  %v859_v25 = vadd.f32 %v847_v55, %v844_v60 }
 0x10d   : > { %888 = vst [vmem:[%s1439_s9 + $0x20] sm:$0xff] %v876_v11  ;;  %889 = vst [vmem:[%s1439_s9 + $0x28] sm:$0xff] %v877_v12  ;;  %v868_v53 = vmax.f32 %v856_v57, 0.0  ;;  %v869_v28 = vmax.f32 %v857_v21, 0.0  ;;  %v870_v45 = vmax.f32 %v858_v34, 0.0 }
 0x10e   : > { %890 = vst [vmem:[%s1439_s9 + $0x30] sm:$0xff] %v878_v16  ;;  %891 = vst [vmem:[%s1439_s9 + $0x38] sm:$0xff] %v879_v20  ;;  %v871_v33 = vmax.f32 %v859_v25, 0.0 }
 0x10f   : > { %v880_v47 = vmin.f32 %v868_v53, 1.0  ;;  %v881_v62 = vmin.f32 %v869_v28, 1.0  ;;  %v882_v15 = vmin.f32 %v870_v45, 1.0 }
 0x110   : > { %v883_v32 = vmin.f32 %v871_v33, 1.0 }
 0x111   : > { %892 = vst [vmem:[%s1439_s9 + $0x40] sm:$0xff] %v880_v47  ;;  %893 = vst [vmem:[%s1439_s9 + $0x48] sm:$0xff] %v881_v62 }
 0x112   : > { %894 = vst [vmem:[%s1439_s9 + $0x50] sm:$0xff] %v882_v15  ;;  %895 = vst [vmem:[%s1439_s9 + $0x58] sm:$0xff] %v883_v32 }
 0x113 PF: > { %s1031_s25 = smul.u32 1536, %s1244_s28  ;;  %s912_s17 = sshll.u32 %s1439_s9, 4  ;;  %s2040_s17 = int_to_ptr.vmem [resolvable:$true] %s912_s17 }
 0x114   : > { %s897_s26 = scalar_lea.sflag [#allocation7], %s1409_s19  ;;  %s1168_s4 = scalar_lea.vmem %s2040_s17, 1536 }
 0x115   : > { %s2038_s23 = scalar_lea.hbm %s2091_s3, %s1031_s25  ;;  %p1169_p1 = scmp.ne.s32.totalorder %s2040_s17, %s1168_s4 }
 0x116   : > { %p2108_p4 = scmp.ne.s32.totalorder %s2096_s11, 0  ;;  %s1259_s5 = smov [#allocation8]  }
 0x117   : > { %s1172_s7 = sshll.u32 %s1259_s5, 4  ;;  %s1173_s7 = int_to_ptr.vmem [resolvable:$false] %s1172_s7 }
 0x118   : > { %p1170_p6 = pnand %p1169_p1, %p2108_p4  ;;  %s1174_s28 = scalar_lea.vmem %s1173_s7, 3072 }
 0x119   : > { %p1175_p11 = scmp.lt.s32.totalorder %s2040_s17, %s1173_s7  ;;  %p1176_p2 = scmp.lt.s32.totalorder %s1174_s28, %s1168_s4 }
 0x11a   : > { %p1171_p9 = pneg %p1170_p6 }
 0x11b   : > { %p1177_p3 = por %p1176_p2, %p1175_p11 }
 0x11d   : > { %p1178_p5 = pnand %p1177_p3, %p1171_p9 }
 0x11f   : > { %1181 = shalt.err (!%p1178_p5)
}
 0x120   : > { %s1182_s8 = scalar_lea.hbm %s2038_s23, 1536  ;;  %s1186_s14 = scalar_lea.hbm %s2091_s3, 3072 }
 0x121   : > { %p1183_p8 = scmp.ne.s32.totalorder %s2038_s23, %s1182_s8  ;;  %p1187_p10 = scmp.lt.u32.totalorder %s2038_s23, %s2091_s3 }
 0x122   : > { %p1188_p12 = scmp.lt.u32.totalorder %s1186_s14, %s1182_s8  ;;  %p1190_p1 = scmp.lt.u32.totalorder %s1182_s8, %s2038_s23 }
 0x123   : > { %p1184_p13 = pnand %p1183_p8, %p2108_p4 }
 0x124   : > { %p1189_p0 = por %p1188_p12, %p1187_p10 }
 0x125   : > { %p1185_p7 = pneg %p1184_p13 }
 0x126   : > { %p1191_p6 = por %p1190_p1, %p1189_p0 }
 0x128   : > { %p1192_p9 = pnand %p1191_p6, %p1185_p7 }
 0x12a   : > { %1195 = shalt.err (!%p1192_p9)
}
 0x12b   : > { %s1260_s18 = smov 512   ;;  %s1261_s21 = smov 32  }
 0x12c   : > { %1034 = dma.vmem_to_hbm [thread:$0]  (%p2108_p4), %s2040_s17, 1536, %s2038_s23, %s897_s26, %s1260_s18, %s1260_s18, %s1261_s21  }
 0x12d PF: > { %s927_s24 = sand.u32 1, %s1232_s0   ;;  %p2109_p11 = scmp.ne.s32.totalorder %s2097_s13, 0 }
 0x12e   : > { %p2110_p2 = scmp.ge.s32.totalorder %s1252_s30, 2  ;;  %s928_s25 = scalar_lea.sflag [#allocation7], %s927_s24 }
 0x130   : > { %p1041_p3 = pnand %p2110_p2, %p2109_p11 }
 0x132   : > { %1227 = dma.done.wait (!%p1041_p3), %s928_s25, 1536  }
 0x133   : > { %1229 = vsyncadd (!%p1041_p3), %s928_s25, 4294965760  ;;  %s27_s30 = sadd.s32 1, %s1252_s30   ;;  %s2111_s0 = smov %s1236_s1 }
 0x134   : > { %p24_p5 = scmp.ge.s32.totalorder %s27_s30, 4   ;;  %s2112_s1 = smov %s1240_s27 }
 0x135   : > { %s2113_s27 = smov %s1353_s12  ;;  %s2114_s28 = smov %s1248_s29 }
 0x136   : > { %s2115_s29 = smov %s2117_s6  ;;  %26 = sbr.rel (!%p24_p5) target bundleno = 28 (0x1c), region = 95 }
 0x13d   :  { %933 = vsyncpa [#allocation6], 1 }
 0x13e   :  { %935 = vsyncpa [#allocation6 + $0x1], 1 }
 0x13f   :  { %936 = vsyncpa [#allocation7], 1 }
 0x140   :  { %938 = vsyncpa [#allocation7 + $0x1], 1 }

</bundles_post_ra>
